<compile_context>
chip_gen: v5e
topology: v5e:2x2
jax: 0.10.0
libtpu: 0.0.40
codegen_flags: <defaults>
</compile_context>

<pallas_src>
import functools
import math

import jax
import jax.numpy as jnp
from jax.experimental import pallas as pl
from jax.experimental.pallas import tpu as pltpu

EMBED = 128
NEG_INF = -1e30                      # Python float: not captured as a jax.Array
ATTN_SCALE = 1.0 / math.sqrt(EMBED)  # head_dim = 128 (num_heads = 1)


def _actor_critic_kernel(state_ref, we_ref, wqkv_ref, wo_ref, w1_ref, w2_ref,
                         bias_ref, out_ref, *, b_real, act_dim):
    bf16 = jnp.bfloat16

    x = state_ref[...].astype(bf16)                                  # (Bp, obs_p)

    # embedding: Linear(obs_dim, 128)
    emb = (jnp.dot(x, we_ref[...], preferred_element_type=jnp.float32)
           + bias_ref[0:1, :EMBED])                                  # (Bp, 128)

    # --- attention: fused q|k|v in_proj, one (Bp,128)x(128,384) MXU push ---
    qkv = (jnp.dot(emb.astype(bf16), wqkv_ref[...],
                   preferred_element_type=jnp.float32)
           + bias_ref[1:2, :])                                       # (Bp, 384)
    q = qkv[:, 0 * EMBED:1 * EMBED]
    k = qkv[:, 1 * EMBED:2 * EMBED]
    v = qkv[:, 2 * EMBED:3 * EMBED]

    scores = jnp.dot(q.astype(bf16), k.astype(bf16).T,
                     preferred_element_type=jnp.float32) * ATTN_SCALE  # (Bp, Bp)
    key_idx = jax.lax.broadcasted_iota(jnp.int32, scores.shape, 1)
    scores = jnp.where(key_idx < b_real, scores, NEG_INF)            # mask pad keys
    scores = scores - jnp.max(scores, axis=-1, keepdims=True)
    e = jnp.exp(scores)
    attn = e * pl.reciprocal(jnp.sum(e, axis=-1, keepdims=True), approx=True)
    # TODO(synk): dropout(p=0.1) on attention weights is train-mode only; eval
    #             forward is identity, so it is intentionally omitted here.
    ctx = jnp.dot(attn.astype(bf16), v.astype(bf16),
                  preferred_element_type=jnp.float32)                # (Bp, 128)
    attn_out = (jnp.dot(ctx.astype(bf16), wo_ref[...],
                        preferred_element_type=jnp.float32)
                + bias_ref[2:3, :EMBED])                             # (Bp, 128)

    # --- fused actor/critic fc1 -> ReLU : one (Bp,128)x(128,256) matmul ---
    h = jnp.maximum(
        jnp.dot(attn_out.astype(bf16), w1_ref[...],
                preferred_element_type=jnp.float32) + bias_ref[3:4, :2 * EMBED],
        0.0)                                                         # (Bp, 256)

    # --- fused lane-dense fc2: block-diag [wa2 ; wc2] padded to 128 lanes ---
    y = (jnp.dot(h.astype(bf16), w2_ref[...],
                 preferred_element_type=jnp.float32)
         + bias_ref[4:5, :EMBED])                                    # (Bp, 128)

    lane = jax.lax.broadcasted_iota(jnp.int32, y.shape, 1)
    logits = jnp.where(lane < act_dim, y, NEG_INF)                   # mask pad cols
    logits = logits - jnp.max(logits, axis=-1, keepdims=True)
    el = jnp.exp(logits)
    probs = el * pl.reciprocal(jnp.sum(el, axis=-1, keepdims=True), approx=True)

    # output slab: [probs(0:act_dim) | value(lane act_dim) | zeros]
    out_ref[...] = jnp.where(lane < act_dim, probs,
                             jnp.where(lane == act_dim, y, 0.0))


def _pack_params(params, act_dim, obs_dim, obs_p):
    f32, bf16 = jnp.float32, jnp.bfloat16

    we = jnp.zeros((obs_p, EMBED), f32).at[:obs_dim, :].set(params["we"])
    w_qkv = jnp.concatenate([params["wq"], params["wk"], params["wv"]], axis=1)
    b_qkv = jnp.concatenate([params["bq"], params["bk"], params["bv"]], axis=1)
    w1 = jnp.concatenate([params["wa1"], params["wc1"]], axis=1)     # (128, 256)
    b1 = jnp.concatenate([params["ba1"], params["bc1"]], axis=1)     # (1, 256)

    w2 = jnp.zeros((2 * EMBED, EMBED), f32)                          # block-diag fc2
    w2 = w2.at[:EMBED, :act_dim].set(params["wa2"])
    w2 = w2.at[EMBED:, act_dim:act_dim + 1].set(params["wc2"])
    b2 = jnp.zeros((1, EMBED), f32)
    b2 = b2.at[:, :act_dim].set(params["ba2"])
    b2 = b2.at[:, act_dim:act_dim + 1].set(params["bc2"])

    def pad_lanes(b):
        return jnp.pad(b, ((0, 0), (0, 3 * EMBED - b.shape[1])))

    bias_slab = jnp.concatenate(
        [pad_lanes(params["be"]), b_qkv, pad_lanes(params["bo"]),
         pad_lanes(b1), pad_lanes(b2), jnp.zeros((3, 3 * EMBED), f32)],
        axis=0)                                                      # (8, 384) f32

    return (we.astype(bf16), w_qkv.astype(bf16), params["wo"].astype(bf16),
            w1.astype(bf16), w2.astype(bf16), bias_slab)


@jax.jit
def actor_critic_forward(state, params):
    B, obs_dim = state.shape
    act_dim = params["wa2"].shape[1]
    Bp = max(128, ((B + 127) // 128) * 128)      # lane/MXU-row dense batch pad
    obs_p = ((obs_dim + 7) // 8) * 8             # sublane-align tiny obs dim

    state_p = jnp.zeros((Bp, obs_p), jnp.float32).at[:B, :obs_dim].set(state)
    we, w_qkv, wo, w1, w2, bias_slab = _pack_params(params, act_dim, obs_dim, obs_p)
    args = (state_p, we, w_qkv, wo, w1, w2, bias_slab)

    flops = 2 * Bp * (obs_p * EMBED + EMBED * 3 * EMBED + 2 * Bp * EMBED
                      + EMBED * EMBED + EMBED * 2 * EMBED + 2 * EMBED * EMBED)
    transcendentals = Bp * Bp + Bp * EMBED + 2 * Bp
    bytes_accessed = sum(int(a.size) * a.dtype.itemsize for a in args) + Bp * EMBED * 4

    vspec = pl.BlockSpec(memory_space=pltpu.MemorySpace.VMEM)
    out = pl.pallas_call(
        functools.partial(_actor_critic_kernel, b_real=B, act_dim=act_dim),
        out_shape=jax.ShapeDtypeStruct((Bp, EMBED), jnp.float32),
        in_specs=[vspec] * len(args),
        out_specs=vspec,
        cost_estimate=pl.CostEstimate(flops=flops,
                                      transcendentals=transcendentals,
                                      bytes_accessed=bytes_accessed),
    )(*args)

    return out[:B, :act_dim], out[:B, act_dim:act_dim + 1]


def reference_forward(state, params):
    """Pure-JAX f32 reference matching the PyTorch module (eval mode)."""
    emb = state @ params["we"] + params["be"]
    q = emb @ params["wq"] + params["bq"]
    k = emb @ params["wk"] + params["bk"]
    v = emb @ params["wv"] + params["bv"]
    scores = (q @ k.T) / jnp.sqrt(jnp.float32(EMBED))
    attn = jax.nn.softmax(scores, axis=-1)
    attn_out = (attn @ v) @ params["wo"] + params["bo"]
    h_a = jax.nn.relu(attn_out @ params["wa1"] + params["ba1"])
    probs = jax.nn.softmax(h_a @ params["wa2"] + params["ba2"], axis=-1)
    h_c = jax.nn.relu(attn_out @ params["wc1"] + params["bc1"])
    value = h_c @ params["wc2"] + params["bc2"]
    return probs, value


def make_params(key, obs_dim, act_dim):
    ks = jax.random.split(key, 10)

    def lin(k, n_in, n_out):
        kw, kb = jax.random.split(k)
        w = jax.random.normal(kw, (n_in, n_out), jnp.float32) * 0.05
        b = jax.random.normal(kb, (1, n_out), jnp.float32) * 0.05
        return w, b

    p = {}
    p["we"], p["be"] = lin(ks[0], obs_dim, EMBED)      # embedding
    p["wq"], p["bq"] = lin(ks[1], EMBED, EMBED)        # attention in_proj (q)
    p["wk"], p["bk"] = lin(ks[2], EMBED, EMBED)        # attention in_proj (k)
    p["wv"], p["bv"] = lin(ks[3], EMBED, EMBED)        # attention in_proj (v)
    p["wo"], p["bo"] = lin(ks[4], EMBED, EMBED)        # attention out_proj
    p["wa1"], p["ba1"] = lin(ks[5], EMBED, EMBED)      # actor fc1
    p["wa2"], p["ba2"] = lin(ks[6], EMBED, act_dim)    # actor fc2
    p["wc1"], p["bc1"] = lin(ks[7], EMBED, EMBED)      # critic fc1
    p["wc2"], p["bc2"] = lin(ks[8], EMBED, 1)          # critic fc2
    return p


if __name__ == "__main__":
    B, OBS_DIM, ACT_DIM = 8, 6, 3   # Acrobot-v1: obs=6, actions=3
    key = jax.random.PRNGKey(0)
    k_state, k_params = jax.random.split(key)

    state = jax.random.normal(k_state, (B, OBS_DIM), jnp.float32)
    params = make_params(k_params, OBS_DIM, ACT_DIM)

    probs, value = actor_critic_forward(state, params)
    jax.block_until_ready((probs, value))

    assert probs.shape == (B, ACT_DIM) and value.shape == (B, 1)
    assert bool(jnp.all(jnp.isfinite(probs))) and bool(jnp.all(jnp.isfinite(value)))
    # softmax rows sum to ~1 (approx reciprocal + bf16 matmuls -> loose tol)
    assert bool(jnp.allclose(jnp.sum(probs, axis=-1), 1.0, atol=1e-2))

    # compare against the pure-JAX f32 reference (bf16 weights -> loose tol)
    probs_ref, value_ref = reference_forward(state, params)
    assert bool(jnp.allclose(probs, probs_ref, atol=2e-2))
    assert bool(jnp.allclose(value, value_ref, atol=2e-2))

    print("KERNEL_OK")
</pallas_src>

<mosaic_0001>
module attributes {stable_mosaic.version = 11 : i64} {
  func.func @_actor_critic_kernel(%arg0: memref<128x8xf32, #tpu.memory_space<vmem>>, %arg1: memref<8x128xbf16, #tpu.memory_space<vmem>>, %arg2: memref<128x384xbf16, #tpu.memory_space<vmem>>, %arg3: memref<128x128xbf16, #tpu.memory_space<vmem>>, %arg4: memref<128x256xbf16, #tpu.memory_space<vmem>>, %arg5: memref<256x128xbf16, #tpu.memory_space<vmem>>, %arg6: memref<8x384xf32, #tpu.memory_space<vmem>>, %arg7: memref<128x128xf32, #tpu.memory_space<vmem>>) attributes {dimension_semantics = [], scalar_prefetch = 0 : i64, scratch_operands = 0 : i64, tpu.core_type = #tpu.core_type<tc>} {
    %c0 = arith.constant 0 : index
    %c0_0 = arith.constant 0 : index
    %0 = vector.load %arg0[%c0, %c0_0] : memref<128x8xf32, #tpu.memory_space<vmem>>, vector<128x8xf32>
    %1 = arith.truncf %0 : vector<128x8xf32> to vector<128x8xbf16>
    %c0_1 = arith.constant 0 : index
    %c0_2 = arith.constant 0 : index
    %2 = vector.load %arg1[%c0_1, %c0_2] : memref<8x128xbf16, #tpu.memory_space<vmem>>, vector<8x128xbf16>
    %cst = arith.constant dense<0.000000e+00> : vector<128x128xf32>
    %3 = tpu.matmul %1, %2, %cst {dimension_numbers = #tpu.dot_dimension_numbers<[1], [0], [0], [1], [0, 0, 1, 1], [], []>} : vector<128x8xbf16>, vector<8x128xbf16>, vector<128x128xf32> -> vector<128x128xf32>
    %c0_3 = arith.constant 0 : index
    %c0_4 = arith.constant 0 : index
    %4 = vector.load %arg6[%c0_3, %c0_4] : memref<8x384xf32, #tpu.memory_space<vmem>>, vector<1x128xf32>
    %5 = vector.broadcast %4 : vector<1x128xf32> to vector<128x128xf32>
    %6 = arith.addf %3, %5 : vector<128x128xf32>
    %7 = arith.truncf %6 : vector<128x128xf32> to vector<128x128xbf16>
    %c0_5 = arith.constant 0 : index
    %c0_6 = arith.constant 0 : index
    %8 = vector.load %arg2[%c0_5, %c0_6] : memref<128x384xbf16, #tpu.memory_space<vmem>>, vector<128x384xbf16>
    %cst_7 = arith.constant dense<0.000000e+00> : vector<128x384xf32>
    %9 = tpu.matmul %7, %8, %cst_7 {dimension_numbers = #tpu.dot_dimension_numbers<[1], [0], [0], [1], [0, 0, 1, 1], [], []>} : vector<128x128xbf16>, vector<128x384xbf16>, vector<128x384xf32> -> vector<128x384xf32>
    %c1 = arith.constant 1 : index
    %c0_8 = arith.constant 0 : index
    %10 = vector.load %arg6[%c1, %c0_8] : memref<8x384xf32, #tpu.memory_space<vmem>>, vector<1x384xf32>
    %11 = vector.broadcast %10 : vector<1x384xf32> to vector<128x384xf32>
    %12 = arith.addf %9, %11 : vector<128x384xf32>
    %13 = vector.extract_strided_slice %12 {offsets = [0, 0], sizes = [128, 128], strides = [1, 1]} : vector<128x384xf32> to vector<128x128xf32>
    %14 = vector.extract_strided_slice %12 {offsets = [0, 128], sizes = [128, 128], strides = [1, 1]} : vector<128x384xf32> to vector<128x128xf32>
    %15 = vector.extract_strided_slice %12 {offsets = [0, 256], sizes = [128, 128], strides = [1, 1]} : vector<128x384xf32> to vector<128x128xf32>
    %16 = arith.truncf %13 : vector<128x128xf32> to vector<128x128xbf16>
    %17 = arith.truncf %14 : vector<128x128xf32> to vector<128x128xbf16>
    %18 = tpu.transpose %17, [1, 0] : vector<128x128xbf16> -> vector<128x128xbf16>
    %cst_9 = arith.constant dense<0.000000e+00> : vector<128x128xf32>
    %19 = tpu.matmul %16, %18, %cst_9 {dimension_numbers = #tpu.dot_dimension_numbers<[1], [0], [0], [1], [0, 0, 1, 1], [], []>} : vector<128x128xbf16>, vector<128x128xbf16>, vector<128x128xf32> -> vector<128x128xf32>
    %cst_10 = arith.constant 0.0883883461 : f32
    %20 = vector.broadcast %cst_10 : f32 to vector<128x128xf32>
    %21 = arith.mulf %19, %20 : vector<128x128xf32>
    %22 = tpu.iota {dimensions = array<i32: 1>} : vector<128x128xi32>
    %c8_i32 = arith.constant 8 : i32
    %23 = vector.broadcast %c8_i32 : i32 to vector<128x128xi32>
    %24 = arith.cmpi slt, %22, %23 : vector<128x128xi32>
    %cst_11 = arith.constant -1.000000e+30 : f32
    %25 = vector.broadcast %cst_11 : f32 to vector<128x128xf32>
    %26 = arith.select %24, %21, %25 : vector<128x128xi1>, vector<128x128xf32>
    %cst_12 = arith.constant dense<0xFF800000> : vector<128xf32>
    %27 = vector.multi_reduction <maximumf>, %26, %cst_12 [1] : vector<128x128xf32> to vector<128xf32>
    %28 = vector.shape_cast %27 : vector<128xf32> to vector<128x1xf32>
    %29 = vector.broadcast %28 : vector<128x1xf32> to vector<128x128xf32>
    %30 = arith.subf %26, %29 : vector<128x128xf32>
    %31 = math.exp %30 : vector<128x128xf32>
    %cst_13 = arith.constant dense<0.000000e+00> : vector<128xf32>
    %32 = vector.multi_reduction <add>, %31, %cst_13 [1] : vector<128x128xf32> to vector<128xf32>
    %33 = vector.shape_cast %32 : vector<128xf32> to vector<128x1xf32>
    %34 = tpu.reciprocal %33 {approx = true} : vector<128x1xf32> -> vector<128x1xf32>
    %35 = vector.broadcast %34 : vector<128x1xf32> to vector<128x128xf32>
    %36 = arith.mulf %31, %35 : vector<128x128xf32>
    %37 = arith.truncf %36 : vector<128x128xf32> to vector<128x128xbf16>
    %38 = arith.truncf %15 : vector<128x128xf32> to vector<128x128xbf16>
    %cst_14 = arith.constant dense<0.000000e+00> : vector<128x128xf32>
    %39 = tpu.matmul %37, %38, %cst_14 {dimension_numbers = #tpu.dot_dimension_numbers<[1], [0], [0], [1], [0, 0, 1, 1], [], []>} : vector<128x128xbf16>, vector<128x128xbf16>, vector<128x128xf32> -> vector<128x128xf32>
    %40 = arith.truncf %39 : vector<128x128xf32> to vector<128x128xbf16>
    %c0_15 = arith.constant 0 : index
    %c0_16 = arith.constant 0 : index
    %41 = vector.load %arg3[%c0_15, %c0_16] : memref<128x128xbf16, #tpu.memory_space<vmem>>, vector<128x128xbf16>
    %cst_17 = arith.constant dense<0.000000e+00> : vector<128x128xf32>
    %42 = tpu.matmul %40, %41, %cst_17 {dimension_numbers = #tpu.dot_dimension_numbers<[1], [0], [0], [1], [0, 0, 1, 1], [], []>} : vector<128x128xbf16>, vector<128x128xbf16>, vector<128x128xf32> -> vector<128x128xf32>
    %c2 = arith.constant 2 : index
    %c0_18 = arith.constant 0 : index
    %43 = vector.load %arg6[%c2, %c0_18] : memref<8x384xf32, #tpu.memory_space<vmem>>, vector<1x128xf32>
    %44 = vector.broadcast %43 : vector<1x128xf32> to vector<128x128xf32>
    %45 = arith.addf %42, %44 : vector<128x128xf32>
    %46 = arith.truncf %45 : vector<128x128xf32> to vector<128x128xbf16>
    %c0_19 = arith.constant 0 : index
    %c0_20 = arith.constant 0 : index
    %47 = vector.load %arg4[%c0_19, %c0_20] : memref<128x256xbf16, #tpu.memory_space<vmem>>, vector<128x256xbf16>
    %cst_21 = arith.constant dense<0.000000e+00> : vector<128x256xf32>
    %48 = tpu.matmul %46, %47, %cst_21 {dimension_numbers = #tpu.dot_dimension_numbers<[1], [0], [0], [1], [0, 0, 1, 1], [], []>} : vector<128x128xbf16>, vector<128x256xbf16>, vector<128x256xf32> -> vector<128x256xf32>
    %c3 = arith.constant 3 : index
    %c0_22 = arith.constant 0 : index
    %49 = vector.load %arg6[%c3, %c0_22] : memref<8x384xf32, #tpu.memory_space<vmem>>, vector<1x256xf32>
    %50 = vector.broadcast %49 : vector<1x256xf32> to vector<128x256xf32>
    %51 = arith.addf %48, %50 : vector<128x256xf32>
    %cst_23 = arith.constant 0.000000e+00 : f32
    %52 = vector.broadcast %cst_23 : f32 to vector<128x256xf32>
    %53 = arith.maximumf %51, %52 : vector<128x256xf32>
    %54 = arith.truncf %53 : vector<128x256xf32> to vector<128x256xbf16>
    %c0_24 = arith.constant 0 : index
    %c0_25 = arith.constant 0 : index
    %55 = vector.load %arg5[%c0_24, %c0_25] : memref<256x128xbf16, #tpu.memory_space<vmem>>, vector<256x128xbf16>
    %cst_26 = arith.constant dense<0.000000e+00> : vector<128x128xf32>
    %56 = tpu.matmul %54, %55, %cst_26 {dimension_numbers = #tpu.dot_dimension_numbers<[1], [0], [0], [1], [0, 0, 1, 1], [], []>} : vector<128x256xbf16>, vector<256x128xbf16>, vector<128x128xf32> -> vector<128x128xf32>
    %c4 = arith.constant 4 : index
    %c0_27 = arith.constant 0 : index
    %57 = vector.load %arg6[%c4, %c0_27] : memref<8x384xf32, #tpu.memory_space<vmem>>, vector<1x128xf32>
    %58 = vector.broadcast %57 : vector<1x128xf32> to vector<128x128xf32>
    %59 = arith.addf %56, %58 : vector<128x128xf32>
    %60 = tpu.iota {dimensions = array<i32: 1>} : vector<128x128xi32>
    %c3_i32 = arith.constant 3 : i32
    %61 = vector.broadcast %c3_i32 : i32 to vector<128x128xi32>
    %62 = arith.cmpi slt, %60, %61 : vector<128x128xi32>
    %cst_28 = arith.constant -1.000000e+30 : f32
    %63 = vector.broadcast %cst_28 : f32 to vector<128x128xf32>
    %64 = arith.select %62, %59, %63 : vector<128x128xi1>, vector<128x128xf32>
    %cst_29 = arith.constant dense<0xFF800000> : vector<128xf32>
    %65 = vector.multi_reduction <maximumf>, %64, %cst_29 [1] : vector<128x128xf32> to vector<128xf32>
    %66 = vector.shape_cast %65 : vector<128xf32> to vector<128x1xf32>
    %67 = vector.broadcast %66 : vector<128x1xf32> to vector<128x128xf32>
    %68 = arith.subf %64, %67 : vector<128x128xf32>
    %69 = math.exp %68 : vector<128x128xf32>
    %cst_30 = arith.constant dense<0.000000e+00> : vector<128xf32>
    %70 = vector.multi_reduction <add>, %69, %cst_30 [1] : vector<128x128xf32> to vector<128xf32>
    %71 = vector.shape_cast %70 : vector<128xf32> to vector<128x1xf32>
    %72 = tpu.reciprocal %71 {approx = true} : vector<128x1xf32> -> vector<128x1xf32>
    %73 = vector.broadcast %72 : vector<128x1xf32> to vector<128x128xf32>
    %74 = arith.mulf %69, %73 : vector<128x128xf32>
    %c3_i32_31 = arith.constant 3 : i32
    %75 = vector.broadcast %c3_i32_31 : i32 to vector<128x128xi32>
    %76 = arith.cmpi slt, %60, %75 : vector<128x128xi32>
    %c3_i32_32 = arith.constant 3 : i32
    %77 = vector.broadcast %c3_i32_32 : i32 to vector<128x128xi32>
    %78 = arith.cmpi eq, %60, %77 : vector<128x128xi32>
    %cst_33 = arith.constant 0.000000e+00 : f32
    %79 = vector.broadcast %cst_33 : f32 to vector<128x128xf32>
    %80 = arith.select %78, %59, %79 : vector<128x128xi1>, vector<128x128xf32>
    %81 = arith.select %76, %74, %80 : vector<128x128xi1>, vector<128x128xf32>
    %c0_34 = arith.constant 0 : index
    %c0_35 = arith.constant 0 : index
    %82 = vector.load %arg7[%c0_34, %c0_35] : memref<128x128xf32, #tpu.memory_space<vmem>>, vector<128x128xf32>
    tpu.vector_store %arg7[%c0_34, %c0_35], %81 {strides = array<i32>} : memref<128x128xf32, #tpu.memory_space<vmem>>, vector<128x128xf32>,
    return
  }
}

</mosaic_0001>

<bundles_post_ra>
// kernel: actor_critic_forward.1
= control target key start
LH: loop header
LB: loop body
LE: loop exit
PB: predicated region body
PF: predicated region fallthrough
CT: control target
= control target key end

     0   :  { %vm78_vm0 = vcmask 1043456   ;;  %vm53_vm1 = vcmask 64512   ;;  %s3190_s1 = inlined_call_operand.vmem [shape: bf16[8,128], index: 1, kind: input, shape index: {}]   ;;  %s3191_s0 = inlined_call_operand.vmem [shape: f32[128,8], index: 0, kind: input, shape index: {}]   ;;  %s3192_s2 = inlined_call_operand.vmem [shape: bf16[128,384], index: 2, kind: input, shape index: {}]   ;;  %s3193_s6 = inlined_call_operand.vmem [shape: f32[8,384], index: 6, kind: input, shape index: {}]   ;;  %s3194_s3 = inlined_call_operand.vmem [shape: bf16[128,128], index: 3, kind: input, shape index: {}]   ;;  %s3195_s4 = inlined_call_operand.vmem [shape: bf16[128,256], index: 4, kind: input, shape index: {}]   ;;  %s3196_s5 = inlined_call_operand.vmem [shape: bf16[256,128], index: 5, kind: input, shape index: {}]   ;;  %s3197_s7 = inlined_call_operand.vmem [shape: f32[128,128], index: 7, kind: output, shape index: {}]  }
   0x1   :  { %v51_v0 = vld [vmem:[%s3190_s1] sm:$0xf]  ;;  %v28_v2 = vld [vmem:[%s3191_s0 + $0x8] sm:$0xff]  ;;  %v29_v5 = vld [vmem:[%s3191_s0 + $0x10] sm:$0xff] }
   0x2   :  { %v27_v1 = vld [vmem:[%s3191_s0] sm:$0xff]  ;;  %v80_v3 = vsel %vm78_vm0, %v51_v0, 0  ;;  %v30_v6 = vld [vmem:[%s3191_s0 + $0x18] sm:$0xff]  ;;  %v32_v9 = vld [vmem:[%s3191_s0 + $0x28] sm:$0xff] }
   0x3   :  { %v43_v4 = vpack.c.bf16 %v28_v2, %v27_v1  ;;  %89 = vmatpush.bf16.msra.mxu0 %v80_v3  ;;  %v44_v7 = vpack.c.bf16 %v30_v6, %v29_v5  ;;  %v31_v8 = vld [vmem:[%s3191_s0 + $0x20] sm:$0xff]  ;;  %v33_v11 = vld [vmem:[%s3191_s0 + $0x30] sm:$0xff]  ;;  %v34_v12 = vld [vmem:[%s3191_s0 + $0x38] sm:$0xff] }
   0x4   :  { %v45_v10 = vpack.c.bf16 %v32_v9, %v31_v8  ;;  %v46_v13 = vpack.c.bf16 %v34_v12, %v33_v11  ;;  %v35_v14 = vld [vmem:[%s3191_s0 + $0x40] sm:$0xff]  ;;  %v36_v15 = vld [vmem:[%s3191_s0 + $0x48] sm:$0xff]  ;;  %v1872_v18 = vld [vmem:[%s3192_s2 + $0xb0] sm:$0xf0] }
   0x5   :  { %v47_v16 = vpack.c.bf16 %v36_v15, %v35_v14  ;;  %v1679_v17 = vld [vmem:[%s3192_s2 + $0xa8] sm:$0xf]  ;;  %v1667_v19 = vld [vmem:[%s3192_s2 + $0x90] sm:$0xf]  ;;  %v1869_v21 = vld [vmem:[%s3192_s2 + $0x98] sm:$0xf0] }
   0x6   :  { %1584 = vmatmul.msk.bf16.vlgmr.msra.gmra.mxu0 %vm53_vm1, %v43_v4  ;;  %v1680_v20 = vor.u32 %v1872_v18, %v1679_v17  ;;  %v1668_v22 = vor.u32 %v1869_v21, %v1667_v19  ;;  %v37_v23 = vld [vmem:[%s3191_s0 + $0x50] sm:$0xff]  ;;  %v38_v24 = vld [vmem:[%s3191_s0 + $0x58] sm:$0xff]  ;;  %v1866_v27 = vld [vmem:[%s3192_s2 + $0x80] sm:$0xf0] }
   0x7   :  { %v48_v25 = vpack.c.bf16 %v38_v24, %v37_v23  ;;  %v1655_v26 = vld [vmem:[%s3192_s2 + $0x78] sm:$0xf]  ;;  %v1643_v28 = vld [vmem:[%s3192_s2 + $0x60] sm:$0xf]  ;;  %v1863_v30 = vld [vmem:[%s3192_s2 + $0x68] sm:$0xf0] }
   0x8   :  { %308 = vmatpush.bf16.msra.mxu1 %v1680_v20  ;;  %1914 = vmatpush.bf16.msra.mxu3 %v1680_v20  ;;  %v1656_v29 = vor.u32 %v1866_v27, %v1655_v26  ;;  %v1644_v31 = vor.u32 %v1863_v30, %v1643_v28  ;;  %v1631_v32 = vld [vmem:[%s3192_s2 + $0x48] sm:$0xf]  ;;  %v1860_v33 = vld [vmem:[%s3192_s2 + $0x50] sm:$0xf0]  ;;  %v39_v35 = vld [vmem:[%s3191_s0 + $0x60] sm:$0xff] }
   0x9   :  { %v1632_v34 = vor.u32 %v1860_v33, %v1631_v32  ;;  %v40_v36 = vld [vmem:[%s3191_s0 + $0x68] sm:$0xff]  ;;  %v1619_v38 = vld [vmem:[%s3192_s2 + $0x30] sm:$0xf]  ;;  %v1857_v39 = vld [vmem:[%s3192_s2 + $0x38] sm:$0xf0] }
   0xa   :  { %v49_v37 = vpack.c.bf16 %v40_v36, %v39_v35  ;;  %v1620_v40 = vor.u32 %v1857_v39, %v1619_v38  ;;  %v1607_v41 = vld [vmem:[%s3192_s2 + $0x18] sm:$0xf]  ;;  %v1854_v42 = vld [vmem:[%s3192_s2 + $0x20] sm:$0xf0]  ;;  %v1595_v44 = vld [vmem:[%s3192_s2] sm:$0xf] }
   0xb   :  { %v1608_v43 = vor.u32 %v1854_v42, %v1607_v41  ;;  %v1851_v45 = vld [vmem:[%s3192_s2 + $0x8] sm:$0xf0]  ;;  %v1681_v48 = vld [vmem:[%s3192_s2 + $0xb4] sm:$0xf0]  ;;  %v41_v49 = vld [vmem:[%s3191_s0 + $0x70] sm:$0xff] }
   0xc   :  { %309 = vmatpush.bf16.msra.mxu1 %v1668_v22  ;;  %1915 = vmatpush.bf16.msra.mxu3 %v1668_v22  ;;  %v1596_v46 = vor.u32 %v1851_v45, %v1595_v44  ;;  %v1871_v47 = vld [vmem:[%s3192_s2 + $0xac] sm:$0xf]  ;;  %v42_v50 = vld [vmem:[%s3191_s0 + $0x78] sm:$0xff]  ;;  %v1868_v53 = vld [vmem:[%s3192_s2 + $0x94] sm:$0xf] }
   0xd   :  { %v1684_v51 = vor.u32 %v1871_v47, %v1681_v48  ;;  %v50_v52 = vpack.c.bf16 %v42_v50, %v41_v49  ;;  %v1669_v54 = vld [vmem:[%s3192_s2 + $0x9c] sm:$0xf0]  ;;  %v1865_v56 = vld [vmem:[%s3192_s2 + $0x7c] sm:$0xf]  ;;  %v1657_v57 = vld [vmem:[%s3192_s2 + $0x84] sm:$0xf0] }
   0xe   :  { %v1672_v55 = vor.u32 %v1868_v53, %v1669_v54  ;;  %v1660_v58 = vor.u32 %v1865_v56, %v1657_v57  ;;  %v1862_v59 = vld [vmem:[%s3192_s2 + $0x64] sm:$0xf]  ;;  %v1645_v60 = vld [vmem:[%s3192_s2 + $0x6c] sm:$0xf0]  ;;  %v1859_v62 = vld [vmem:[%s3192_s2 + $0x4c] sm:$0xf] }
   0xf   :  { %1922 = vmatpush.bf16.msra.mxu2 %v1684_v51  ;;  %v1648_v61 = vor.u32 %v1862_v59, %v1645_v60  ;;  %v1633_v63 = vld [vmem:[%s3192_s2 + $0x54] sm:$0xf0]  ;;  %v1856_v1 = vld [vmem:[%s3192_s2 + $0x34] sm:$0xf]  ;;  %v1621_v2 = vld [vmem:[%s3192_s2 + $0x3c] sm:$0xf0] }
  0x10   :  { %310 = vmatpush.bf16.msra.mxu1 %v1656_v29  ;;  %1916 = vmatpush.bf16.msra.mxu3 %v1656_v29  ;;  %v1636_v0 = vor.u32 %v1859_v62, %v1633_v63  ;;  %v1624_v4 = vor.u32 %v1856_v1, %v1621_v2  ;;  %v1853_v5 = vld [vmem:[%s3192_s2 + $0x1c] sm:$0xf]  ;;  %v1609_v6 = vld [vmem:[%s3192_s2 + $0x24] sm:$0xf0]  ;;  %v2250_v8 = vld [vmem:[%s3193_s6] ss:$0 sm:$0xff] }
  0x11   :  { %v1850_v9 = vld [vmem:[%s3192_s2 + $0x4] sm:$0xf]  ;;  %v1687_v36 = vld [vmem:[%s3192_s2 + $0xb0] sm:$0xf]  ;;  %v1867_v44 = vld [vmem:[%s3192_s2 + $0x88] sm:$0xf0] }
  0x12   :  { %v1870_v41 = vld [vmem:[%s3192_s2 + $0xa0] sm:$0xf0]  ;;  %v1651_v47 = vld [vmem:[%s3192_s2 + $0x68] sm:$0xf]  ;;  %v1864_v48 = vld [vmem:[%s3192_s2 + $0x70] sm:$0xf0] }
  0x13   :  { %1923 = vmatpush.bf16.msra.mxu2 %v1672_v55  ;;  %v1639_v53 = vld [vmem:[%s3192_s2 + $0x50] sm:$0xf]  ;;  %v1861_v54 = vld [vmem:[%s3192_s2 + $0x58] sm:$0xf0]  ;;  %v1627_v56 = vld [vmem:[%s3192_s2 + $0x38] sm:$0xf] }
  0x14   :  { %311 = vmatpush.bf16.msra.mxu1 %v1644_v31  ;;  %1917 = vmatpush.bf16.msra.mxu3 %v1644_v31  ;;  %v1858_v57 = vld [vmem:[%s3192_s2 + $0x40] sm:$0xf0]  ;;  %v1615_v60 = vld [vmem:[%s3192_s2 + $0x20] sm:$0xf]  ;;  %v1852_v1 = vld [vmem:[%s3192_s2 + $0x10] sm:$0xf0] }
  0x16   :  { %1585 = vmatmul.msk.bf16.gmra.mxu0 %vm53_vm1, %v44_v7  ;;  %v1612_v7 = vor.u32 %v1853_v5, %v1609_v6 }
  0x17   :  { %1924 = vmatpush.bf16.msra.mxu2 %v1660_v58 }
  0x18   :  { %312 = vmatpush.bf16.msra.mxu1 %v1632_v34  ;;  %1918 = vmatpush.bf16.msra.mxu3 %v1632_v34 }
  0x1b   :  { %1925 = vmatpush.bf16.msra.mxu2 %v1648_v61 }
  0x1c   :  { %313 = vmatpush.bf16.msra.mxu1 %v1620_v40  ;;  %1919 = vmatpush.bf16.msra.mxu3 %v1620_v40  ;;  %v1675_v40 = vld [vmem:[%s3192_s2 + $0x98] sm:$0xf] }
  0x1d   :  { %v1676_v42 = vor.u32 %v1870_v41, %v1675_v40 }
  0x1f   :  { %1926 = vmatpush.bf16.msra.mxu2 %v1636_v0 }
  0x20   :  { %314 = vmatpush.bf16.msra.mxu1 %v1608_v43  ;;  %1920 = vmatpush.bf16.msra.mxu3 %v1608_v43  ;;  %v1663_v43 = vld [vmem:[%s3192_s2 + $0x80] sm:$0xf] }
  0x21   :  { %v1664_v45 = vor.u32 %v1867_v44, %v1663_v43 }
  0x23   :  { %1927 = vmatpush.bf16.msra.mxu2 %v1624_v4 }
  0x24   :  { %315 = vmatpush.bf16.msra.mxu1 %v1596_v46  ;;  %1921 = vmatpush.bf16.msra.mxu3 %v1596_v46 }
  0x26   :  { %1586 = vmatmul.msk.bf16.gmra.mxu0 %vm53_vm1, %v45_v10  ;;  %v1597_v10 = vld [vmem:[%s3192_s2 + $0xc] sm:$0xf0] }
  0x27   :  { %1928 = vmatpush.bf16.msra.mxu2 %v1612_v7  ;;  %v1600_v12 = vor.u32 %v1850_v9, %v1597_v10 }
  0x28   :  { %357 = vmatpush.bf16.msrb.mxu1 %v1684_v51  ;;  %v1652_v51 = vor.u32 %v1864_v48, %v1651_v47 }
  0x2b   :  { %1929 = vmatpush.bf16.msra.mxu2 %v1600_v12 }
  0x2c   :  { %358 = vmatpush.bf16.msrb.mxu1 %v1672_v55  ;;  %v1640_v55 = vor.u32 %v1861_v54, %v1639_v53 }
  0x30   :  { %359 = vmatpush.bf16.msrb.mxu1 %v1660_v58  ;;  %v1628_v58 = vor.u32 %v1858_v57, %v1627_v56 }
  0x34   :  { %360 = vmatpush.bf16.msrb.mxu1 %v1648_v61  ;;  %v1855_v61 = vld [vmem:[%s3192_s2 + $0x28] sm:$0xf0] }
  0x35   :  { %v1616_v62 = vor.u32 %v1855_v61, %v1615_v60 }
  0x36   :  { %1587 = vmatmul.msk.bf16.gmra.mxu0 %vm53_vm1, %v46_v13 }
  0x38   :  { %361 = vmatpush.bf16.msrb.mxu1 %v1636_v0  ;;  %v1603_v0 = vld [vmem:[%s3192_s2 + $0x8] sm:$0xf] }
  0x3c   :  { %362 = vmatpush.bf16.msrb.mxu1 %v1624_v4  ;;  %v1604_v4 = vor.u32 %v1852_v1, %v1603_v0 }
  0x40   :  { %363 = vmatpush.bf16.msrb.mxu1 %v1612_v7 }
  0x44   :  { %364 = vmatpush.bf16.msrb.mxu1 %v1600_v12 }
  0x46   :  { %1588 = vmatmul.msk.bf16.gmra.mxu0 %vm53_vm1, %v47_v16 }
  0x56   :  { %1589 = vmatmul.msk.bf16.gmra.mxu0 %vm53_vm1, %v48_v25 }
  0x66   :  { %1590 = vmatmul.msk.bf16.gmra.mxu0 %vm53_vm1, %v49_v37  ;;  %v1873_v37 = vld [vmem:[%s3192_s2 + $0xb8] sm:$0xf0] }
  0x67   :  { %v1688_v38 = vor.u32 %v1873_v37, %v1687_v36 }
  0x69   :  { %406 = vmatpush.bf16.msrb.mxu3 %v1688_v38 }
  0x6d   :  { %407 = vmatpush.bf16.msrb.mxu3 %v1676_v42 }
  0x71   :  { %408 = vmatpush.bf16.msrb.mxu3 %v1664_v45 }
  0x75   :  { %409 = vmatpush.bf16.msrb.mxu3 %v1652_v51 }
  0x76   :  { %1591 = vmatmul.msk.bf16.gmra.mxu0 %vm53_vm1, %v50_v52 }
  0x79   :  { %410 = vmatpush.bf16.msrb.mxu3 %v1640_v55 }
  0x7d   :  { %411 = vmatpush.bf16.msrb.mxu3 %v1628_v58 }
  0x81   :  { %412 = vmatpush.bf16.msrb.mxu3 %v1616_v62 }
  0x83   :  { %v91_v3 = vpop.f32.mrf.mxu0 }
  0x84   :  { %v92_v13 = vadd.f32 %v91_v3, %v2250_v8 }
  0x85   :  { %413 = vmatpush.bf16.msrb.mxu3 %v1604_v4 }
  0x8b   :  { %v93_v11 = vpop.f32.mrf.mxu0 }
  0x8c   :  { %v94_v14 = vadd.f32 %v93_v11, %v2250_v8 }
  0x8e   :  { %v2260_v15 = vpack.c.bf16 %v94_v14, %v92_v13  ;;  %v1592_v14 = vld [vmem:[%s3193_s6 + $0x1] ss:$8 sm:$0x7] }
  0x8f   :  { %v175_v44 = vperm.slane %v1592_v14, 1 }
  0x90   :  { %316 = vmatmul.bf16.vlgmr.msra.gmra.mxu1 %v2260_v15 }
  0x93   :  { %v96_v16 = vpop.f32.mrf.mxu0 }
  0x94   :  { %v97_v18 = vadd.f32 %v96_v16, %v2250_v8  ;;  %v2350_v16 = vperm.slane %v1592_v14, 0 }
  0x9b   :  { %v98_v17 = vpop.f32.mrf.mxu0 }
  0x9c   :  { %v99_v19 = vadd.f32 %v98_v17, %v2250_v8 }
  0x9e   :  { %v2265_v20 = vpack.c.bf16 %v99_v19, %v97_v18 }
  0xa0   :  { %321 = vmatmul.bf16.gmra.mxu1 %v2265_v20 }
  0xa3   :  { %v101_v21 = vpop.f32.mrf.mxu0 }
  0xa4   :  { %v102_v23 = vadd.f32 %v101_v21, %v2250_v8 }
  0xab   :  { %v103_v22 = vpop.f32.mrf.mxu0 }
  0xac   :  { %v104_v24 = vadd.f32 %v103_v22, %v2250_v8 }
  0xae   :  { %v2270_v25 = vpack.c.bf16 %v104_v24, %v102_v23 }
  0xb0   :  { %326 = vmatmul.bf16.vlgmr.msra.gmra.mxu3 %v2270_v25  ;;  %365 = vmatmul.bf16.vlgmr.msrb.gmra.mxu1 %v2260_v15 }
  0xb1   :  { %375 = vmatmul.bf16.vlgmr.msra.gmra.mxu2 %v2270_v25 }
  0xb3   :  { %v106_v26 = vpop.f32.mrf.mxu0 }
  0xb4   :  { %v107_v28 = vadd.f32 %v106_v26, %v2250_v8 }
  0xbb   :  { %v108_v27 = vpop.f32.mrf.mxu0 }
  0xbc   :  { %v109_v29 = vadd.f32 %v108_v27, %v2250_v8 }
  0xbe   :  { %v2277_v30 = vpack.c.bf16 %v109_v29, %v107_v28 }
  0xc0   :  { %331 = vmatmul.bf16.gmra.mxu3 %v2277_v30  ;;  %370 = vmatmul.bf16.gmra.mxu1 %v2265_v20 }
  0xc1   :  { %380 = vmatmul.bf16.gmra.mxu2 %v2277_v30 }
  0xc3   :  { %v111_v31 = vpop.f32.mrf.mxu0 }
  0xc4   :  { %v112_v33 = vadd.f32 %v111_v31, %v2250_v8 }
  0xcb   :  { %v113_v32 = vpop.f32.mrf.mxu0 }
  0xcc   :  { %v114_v34 = vadd.f32 %v113_v32, %v2250_v8 }
  0xce   :  { %v2284_v35 = vpack.c.bf16 %v114_v34, %v112_v33 }
  0xd0   :  { %336 = vmatmul.bf16.gmra.mxu3 %v2284_v35 }
  0xd1   :  { %385 = vmatmul.bf16.gmra.mxu2 %v2284_v35 }
  0xd3   :  { %v116_v39 = vpop.f32.mrf.mxu0 }
  0xd4   :  { %v117_v49 = vadd.f32 %v116_v39, %v2250_v8 }
  0xdb   :  { %v118_v46 = vpop.f32.mrf.mxu0 }
  0xdc   :  { %v119_v50 = vadd.f32 %v118_v46, %v2250_v8 }
  0xde   :  { %v136_v52 = vpack.c.bf16 %v119_v50, %v117_v49  ;;  %v2394_v50 = vperm.slane %v1592_v14, 2 }
  0xe0   :  { %341 = vmatmul.bf16.gmra.mxu3 %v136_v52 }
  0xe1   :  { %390 = vmatmul.bf16.gmra.mxu2 %v136_v52 }
  0xe3   :  { %v121_v59 = vpop.f32.mrf.mxu0 }
  0xe4   :  { %v122_v2 = vadd.f32 %v121_v59, %v2250_v8 }
  0xeb   :  { %v123_v63 = vpop.f32.mrf.mxu0 }
  0xec   :  { %v124_v3 = vadd.f32 %v123_v63, %v2250_v8 }
  0xee   :  { %v137_v5 = vpack.c.bf16 %v124_v3, %v122_v2 }
  0xf0   :  { %346 = vmatmul.bf16.gmra.mxu3 %v137_v5 }
  0xf1   :  { %395 = vmatmul.bf16.gmra.mxu2 %v137_v5 }
  0xf3   :  { %v126_v6 = vpop.f32.mrf.mxu0 }
  0xf4   :  { %v127_v9 = vadd.f32 %v126_v6, %v2250_v8 }
  0xfb   :  { %v128_v7 = vpop.f32.mrf.mxu0 }
  0xfc   :  { %v129_v10 = vadd.f32 %v128_v7, %v2250_v8 }
  0xfe   :  { %v138_v11 = vpack.c.bf16 %v129_v10, %v127_v9 }
 0x100   :  { %351 = vmatmul.bf16.gmra.mxu3 %v138_v11 }
 0x101   :  { %400 = vmatmul.bf16.gmra.mxu2 %v138_v11 }
 0x10d   :  { %v2380_v36 = vpop.f32.mrf.mxu1 }
 0x110   :  { %414 = vmatmul.bf16.vlgmr.msrb.gmra.mxu3 %v2260_v15 }
 0x115   :  { %v2386_v39 = vpop.f32.mrf.mxu1 }
 0x11d   :  { %v2390_v43 = vpop.f32.mrf.mxu1 }
 0x120   :  { %419 = vmatmul.bf16.gmra.mxu3 %v2265_v20 }
 0x125   :  { %v324_v51 = vpop.f32.mrf.mxu1 }
 0x12d   :  { %v366_v57 = vpop.f32.mrf.mxu1 }
 0x130   :  { %424 = vmatmul.bf16.gmra.mxu3 %v2270_v25 }
 0x133   :  { %v327_v12 = vpop.f32.mrf.mxu3 }
 0x134   :  { %v2345_v13 = vpop.f32.mrf.mxu2  ;;  %v2353_v8 = vadd.f32 %v327_v12, %v2350_v16 }
 0x135   :  { %v368_v2 = vpop.f32.mrf.mxu1 }
 0x13b   :  { %v329_v17 = vpop.f32.mrf.mxu3 }
 0x13c   :  { %v2356_v18 = vadd.f32 %v329_v17, %v2350_v16  ;;  %v2358_v15 = vpop.f32.mrf.mxu2 }
 0x13d   :  { %v379_v17 = vadd.f32 %v2358_v15, %v175_v44 }
 0x13e   :  { %v457_v19 = vpack.c.bf16 %v2356_v18, %v2353_v8 }
 0x140   :  { %429 = vmatmul.bf16.gmra.mxu3 %v2277_v30 }
 0x143   :  { %v332_v20 = vpop.f32.mrf.mxu3 }
 0x144   :  { %v381_v21 = vpop.f32.mrf.mxu2  ;;  %v2364_v23 = vadd.f32 %v332_v20, %v2350_v16 }
 0x145   :  { %v382_v10 = vadd.f32 %v381_v21, %v175_v44 }
 0x14b   :  { %v334_v22 = vpop.f32.mrf.mxu3 }
 0x14c   :  { %v2367_v24 = vadd.f32 %v334_v22, %v2350_v16  ;;  %v383_v25 = vpop.f32.mrf.mxu2 }
 0x14d   :  { %v384_v6 = vadd.f32 %v383_v25, %v175_v44 }
 0x14e   :  { %v458_v26 = vpack.c.bf16 %v2367_v24, %v2364_v23 }
 0x14f   :  { %v466_v14 = vpack.c.bf16 %v384_v6, %v382_v10 }
 0x150   :  { %434 = vmatmul.bf16.gmra.mxu3 %v2284_v35 }
 0x153   :  { %v2372_v27 = vpop.f32.mrf.mxu3 }
 0x154   :  { %v386_v28 = vpop.f32.mrf.mxu2 }
 0x155   :  { %v387_v4 = vadd.f32 %v386_v28, %v175_v44  ;;  %v377_v28 = vadd.f32 %v2345_v13, %v175_v44  ;;  %v320_v13 = vadd.f32 %v2386_v39, %v2350_v16 }
 0x157   :  { %v465_v25 = vpack.c.bf16 %v379_v17, %v377_v28 }
 0x15b   :  { %v2374_v29 = vpop.f32.mrf.mxu3 }
 0x15c   :  { %v388_v30 = vpop.f32.mrf.mxu2 }
 0x15d   :  { %v389_v0 = vadd.f32 %v388_v30, %v175_v44 }
 0x160   :  { %439 = vmatmul.bf16.gmra.mxu3 %v136_v52 }
 0x163   :  { %v2376_v31 = vpop.f32.mrf.mxu3 }
 0x164   :  { %v391_v32 = vpop.f32.mrf.mxu2  ;;  %v343_v17 = vadd.f32 %v2376_v31, %v2350_v16 }
 0x165   :  { %v392_v61 = vadd.f32 %v391_v32, %v175_v44 }
 0x16b   :  { %v2378_v33 = vpop.f32.mrf.mxu3 }
 0x16c   :  { %v393_v34 = vpop.f32.mrf.mxu2 }
 0x16d   :  { %v394_v58 = vadd.f32 %v393_v34, %v175_v44 }
 0x16f   :  { %v468_v63 = vpack.c.bf16 %v394_v58, %v392_v61 }
 0x170   :  { %444 = vmatmul.bf16.gmra.mxu3 %v137_v5  ;;  %v467_v5 = vpack.c.bf16 %v389_v0, %v387_v4 }
 0x173   :  { %v2382_v37 = vpop.f32.mrf.mxu3 }
 0x174   :  { %v396_v38 = vpop.f32.mrf.mxu2 }
 0x175   :  { %v397_v55 = vadd.f32 %v396_v38, %v175_v44 }
 0x17b   :  { %v2384_v35 = vpop.f32.mrf.mxu3 }
 0x17c   :  { %v398_v40 = vpop.f32.mrf.mxu2 }
 0x17d   :  { %v399_v52 = vadd.f32 %v398_v40, %v175_v44 }
 0x17f   :  { %v469_v56 = vpack.c.bf16 %v399_v52, %v397_v55 }
 0x180   :  { %449 = vmatmul.bf16.gmra.mxu3 %v138_v11  ;;  %v371_v11 = vpop.f32.mrf.mxu1 }
 0x181   :  { %v372_v38 = vadd.f32 %v371_v11, %v175_v44 }
 0x183   :  { %v2388_v41 = vpop.f32.mrf.mxu3 }
 0x184   :  { %v401_v42 = vpop.f32.mrf.mxu2  ;;  %v353_v28 = vadd.f32 %v2388_v41, %v2350_v16 }
 0x185   :  { %v402_v47 = vadd.f32 %v401_v42, %v175_v44 }
 0x188   :  { %v373_v30 = vpop.f32.mrf.mxu1 }
 0x189   :  { %v374_v32 = vadd.f32 %v373_v30, %v175_v44 }
 0x18b   :  { %v2392_v45 = vpop.f32.mrf.mxu3  ;;  %v464_v42 = vpack.c.bf16 %v374_v32, %v372_v38 }
 0x18c   :  { %v403_v46 = vpop.f32.mrf.mxu2 }
 0x18d   :  { %v404_v48 = vadd.f32 %v403_v46, %v175_v44  ;;  %v369_v46 = vadd.f32 %v368_v2, %v175_v44 }
 0x18f   :  { %v470_v49 = vpack.c.bf16 %v404_v48, %v402_v47  ;;  %v367_v48 = vadd.f32 %v366_v57, %v175_v44  ;;  %v323_v57 = vadd.f32 %v2390_v43, %v2350_v16  ;;  %v340_v43 = vadd.f32 %v2374_v29, %v2350_v16 }
 0x191   :  { %471 = vmatpush.bf16.xpose.msrb.mxu0 %v470_v49  ;;  %v463_v49 = vpack.c.bf16 %v369_v46, %v367_v48 }
 0x193   :  { %v415_v53 = vpop.f32.mrf.mxu3 }
 0x194   :  { %v2397_v54 = vadd.f32 %v415_v53, %v2394_v50  ;;  %v318_v53 = vadd.f32 %v2380_v36, %v2350_v16 }
 0x199   :  { %472 = vmatpush.bf16.xpose.msrb.mxu0 %v469_v56  ;;  %v455_v56 = vpack.c.bf16 %v320_v13, %v318_v53 }
 0x19b   :  { %v417_v59 = vpop.f32.mrf.mxu3 }
 0x19c   :  { %v2400_v60 = vadd.f32 %v417_v59, %v2394_v50 }
 0x19e   :  { %v707_v62 = vpack.c.bf16 %v2400_v60, %v2397_v54 }
 0x1a1   :  { %473 = vmatpush.bf16.xpose.msrb.mxu0 %v468_v63  ;;  %v325_v63 = vadd.f32 %v324_v51, %v2350_v16 }
 0x1a3   :  { %v420_v1 = vpop.f32.mrf.mxu3 }
 0x1a4   :  { %v2405_v3 = vadd.f32 %v420_v1, %v2394_v50  ;;  %v456_v1 = vpack.c.bf16 %v325_v63, %v323_v57 }
 0x1a9   :  { %474 = vmatpush.bf16.xpose.msrb.mxu0 %v467_v5 }
 0x1ab   :  { %v422_v7 = vpop.f32.mrf.mxu3 }
 0x1ac   :  { %v2408_v9 = vadd.f32 %v422_v7, %v2394_v50  ;;  %v338_v7 = vadd.f32 %v2372_v27, %v2350_v16  ;;  %v345_v27 = vadd.f32 %v2378_v33, %v2350_v16  ;;  %v355_v33 = vadd.f32 %v2392_v45, %v2350_v16 }
 0x1ae   :  { %v708_v12 = vpack.c.bf16 %v2408_v9, %v2405_v3  ;;  %v459_v8 = vpack.c.bf16 %v340_v43, %v338_v7  ;;  %v462_v3 = vpack.c.bf16 %v355_v33, %v353_v28  ;;  %v536_v9 = vlaneseq }
 0x1b1   :  { %475 = vmatpush.bf16.xpose.msrb.mxu0 %v466_v14 }
 0x1b3   :  { %v425_v20 = vpop.f32.mrf.mxu3 }
 0x1b4   :  { %v2414_v22 = vadd.f32 %v425_v20, %v2394_v50  ;;  %v460_v20 = vpack.c.bf16 %v345_v27, %v343_v17 }
 0x1b9   :  { %476 = vmatpush.bf16.xpose.msrb.mxu0 %v465_v25 }
 0x1bb   :  { %v427_v34 = vpop.f32.mrf.mxu3 }
 0x1bc   :  { %v428_v21 = vadd.f32 %v427_v34, %v2394_v50 }
 0x1be   :  { %v709_v40 = vpack.c.bf16 %v428_v21, %v2414_v22  ;;  %v348_v22 = vadd.f32 %v2382_v37, %v2350_v16 }
 0x1c1   :  { %477 = vmatpush.bf16.xpose.msrb.mxu0 %v464_v42 }
 0x1c3   :  { %v430_v15 = vpop.f32.mrf.mxu3 }
 0x1c4   :  { %v431_v47 = vadd.f32 %v430_v15, %v2394_v50 }
 0x1c9   :  { %478 = vmatpush.bf16.xpose.msrb.mxu0 %v463_v49 }
 0x1cb   :  { %v432_v52 = vpop.f32.mrf.mxu3 }
 0x1cc   :  { %v433_v55 = vadd.f32 %v432_v52, %v2394_v50 }
 0x1ce   :  { %v710_v58 = vpack.c.bf16 %v433_v55, %v431_v47 }
 0x1d0   :  { %479 = vmatmul.bf16.vlgmr.msrb.gmra.mxu0 %v455_v56 }
 0x1d3   :  { %v435_v59 = vpop.f32.mrf.mxu3 }
 0x1d4   :  { %v436_v61 = vadd.f32 %v435_v59, %v2394_v50 }
 0x1db   :  { %v437_v44 = vpop.f32.mrf.mxu3 }
 0x1dc   :  { %v438_v39 = vadd.f32 %v437_v44, %v2394_v50 }
 0x1de   :  { %v711_v0 = vpack.c.bf16 %v438_v39, %v436_v61 }
 0x1e0   :  { %484 = vmatmul.bf16.gmra.mxu0 %v456_v1 }
 0x1e3   :  { %v440_v36 = vpop.f32.mrf.mxu3 }
 0x1eb   :  { %v442_v2 = vpop.f32.mrf.mxu3 }
 0x1ec   :  { %v443_v23 = vadd.f32 %v442_v2, %v2394_v50 }
 0x1f0   :  { %489 = vmatmul.bf16.gmra.mxu0 %v457_v19 }
 0x1f3   :  { %v445_v4 = vpop.f32.mrf.mxu3 }
 0x1f4   :  { %v446_v14 = vadd.f32 %v445_v4, %v2394_v50 }
 0x1fb   :  { %v447_v5 = vpop.f32.mrf.mxu3 }
 0x1fc   :  { %v448_v18 = vadd.f32 %v447_v5, %v2394_v50 }
 0x1fe   :  { %v713_v24 = vpack.c.bf16 %v448_v18, %v446_v14 }
 0x200   :  { %494 = vmatmul.bf16.gmra.mxu0 %v458_v26  ;;  %v441_v26 = vadd.f32 %v440_v36, %v2394_v50 }
 0x202   :  { %v712_v29 = vpack.c.bf16 %v443_v23, %v441_v26 }
 0x203   :  { %v450_v51 = vpop.f32.mrf.mxu3 }
 0x204   :  { %v451_v10 = vadd.f32 %v450_v51, %v2394_v50 }
 0x20b   :  { %v452_v6 = vpop.f32.mrf.mxu3 }
 0x20c   :  { %v453_v11 = vadd.f32 %v452_v6, %v2394_v50  ;;  %v350_v50 = vadd.f32 %v2384_v35, %v2350_v16 }
 0x20e   :  { %v714_v19 = vpack.c.bf16 %v453_v11, %v451_v10  ;;  %v461_v31 = vpack.c.bf16 %v350_v50, %v348_v22 }
 0x210   :  { %499 = vmatmul.bf16.gmra.mxu0 %v459_v8  ;;  %715 = vmatpush.bf16.msra.mxu1 %v714_v19 }
 0x214   :  { %716 = vmatpush.bf16.msra.mxu1 %v713_v24 }
 0x218   :  { %717 = vmatpush.bf16.msra.mxu1 %v712_v29 }
 0x21c   :  { %718 = vmatpush.bf16.msra.mxu1 %v711_v0 }
 0x220   :  { %504 = vmatmul.bf16.gmra.mxu0 %v460_v20  ;;  %719 = vmatpush.bf16.msra.mxu1 %v710_v58 }
 0x224   :  { %720 = vmatpush.bf16.msra.mxu1 %v709_v40 }
 0x228   :  { %721 = vmatpush.bf16.msra.mxu1 %v708_v12  ;;  %v2464_v12 = vand.u32 127, %v536_v9 }
 0x22a   :  { %vm538_vm2 = vcmp.lt.s32.totalorder %v2464_v12, 8  ;;  %vm1370_vm3 = vcmp.lt.s32.totalorder %v2464_v12, 3  ;;  %vm1531_vm4 = vcmp.eq.s32.totalorder %v2464_v12, 3 }
 0x22c   :  { %722 = vmatpush.bf16.msra.mxu1 %v707_v62 }
 0x230   :  { %509 = vmatmul.bf16.gmra.mxu0 %v461_v31 }
 0x240   :  { %514 = vmatmul.bf16.gmra.mxu0 %v462_v3 }
 0x24d   :  { %v480_v35 = vpop.f32.mrf.mxu0 }
 0x24e   :  { %v520_v37 = vmul.f32 0.088388346, %v480_v35 }
 0x250   :  { %v539_v54 = vsel %vm538_vm2, %v520_v37, -1e+30 }
 0x251   :  { %555 = vmax.xlane.f32.xlu0 %v539_v54 }
 0x255   :  { %v482_v60 = vpop.f32.mrf.mxu0 }
 0x256   :  { %v521_v62 = vmul.f32 0.088388346, %v482_v60 }
 0x258   :  { %v540_v45 = vsel %vm538_vm2, %v521_v62, -1e+30 }
 0x259   :  { %557 = vmax.xlane.f32.xlu0 %v540_v45 }
 0x25d   :  { %v485_v16 = vpop.f32.mrf.mxu0 }
 0x25e   :  { %v522_v41 = vmul.f32 0.088388346, %v485_v16 }
 0x260   :  { %v541_v25 = vsel %vm538_vm2, %v522_v41, -1e+30 }
 0x261   :  { %559 = vmax.xlane.f32.xlu1 %v541_v25 }
 0x265   :  { %v487_v30 = vpop.f32.mrf.mxu0 }
 0x266   :  { %v523_v32 = vmul.f32 0.088388346, %v487_v30 }
 0x268   :  { %v542_v34 = vsel %vm538_vm2, %v523_v32, -1e+30 }
 0x269   :  { %561 = vmax.xlane.f32.xlu1 %v542_v34 }
 0x26d   :  { %v490_v21 = vpop.f32.mrf.mxu0 }
 0x26e   :  { %v524_v38 = vmul.f32 0.088388346, %v490_v21 }
 0x270   :  { %v543_v40 = vsel %vm538_vm2, %v524_v38, -1e+30 }
 0x271   :  { %563 = vmax.xlane.f32.xlu2 %v543_v40 }
 0x275   :  { %v492_v42 = vpop.f32.mrf.mxu0 }
 0x276   :  { %v525_v46 = vmul.f32 0.088388346, %v492_v42 }
 0x278   :  { %v544_v15 = vsel %vm538_vm2, %v525_v46, -1e+30 }
 0x279   :  { %565 = vmax.xlane.f32.xlu2 %v544_v15 }
 0x27d   :  { %v495_v47 = vpop.f32.mrf.mxu0 }
 0x27e   :  { %v526_v48 = vmul.f32 0.088388346, %v495_v47 }
 0x280   :  { %v2481_v49 = vsel %vm538_vm2, %v526_v48, -1e+30 }
 0x281   :  { %567 = vmax.xlane.f32.xlu0 %v2481_v49 }
 0x285   :  { %v497_v13 = vpop.f32.mrf.mxu0 }
 0x286   :  { %v527_v52 = vmul.f32 0.088388346, %v497_v13 }
 0x288   :  { %v2486_v53 = vsel %vm538_vm2, %v527_v52, -1e+30 }
 0x289   :  { %569 = vmax.xlane.f32.xlu1 %v2486_v53 }
 0x28d   :  { %v500_v55 = vpop.f32.mrf.mxu0 }
 0x28e   :  { %v528_v56 = vmul.f32 0.088388346, %v500_v55 }
 0x290   :  { %v2491_v58 = vsel %vm538_vm2, %v528_v56, -1e+30 }
 0x291   :  { %571 = vmax.xlane.f32.xlu1 %v2491_v58 }
 0x295   :  { %v502_v59 = vpop.f32.mrf.mxu0 }
 0x296   :  { %v529_v2 = vmul.f32 0.088388346, %v502_v59 }
 0x298   :  { %v2501_v6 = vsel %vm538_vm2, %v529_v2, -1e+30 }
 0x29d   :  { %v505_v0 = vpop.f32.mrf.mxu0 }
 0x29e   :  { %v530_v10 = vmul.f32 0.088388346, %v505_v0 }
 0x2a0   :  { %v2509_v14 = vsel %vm538_vm2, %v530_v10, -1e+30 }
 0x2a5   :  { %v507_v7 = vpop.f32.mrf.mxu0 }
 0x2a6   :  { %v531_v24 = vmul.f32 0.088388346, %v507_v7 }
 0x2a8   :  { %v2517_v20 = vsel %vm538_vm2, %v531_v24, -1e+30 }
 0x2ad   :  { %v510_v23 = vpop.f32.mrf.mxu0 }
 0x2ae   :  { %v532_v50 = vmul.f32 0.088388346, %v510_v23 }
 0x2b0   :  { %v2525_v9 = vsel %vm538_vm2, %v532_v50, -1e+30  ;;  %v1879_v50 = vld [vmem:[%s3194_s3 + $0x28] sm:$0xff] }
 0x2b5   :  { %v512_v22 = vpop.f32.mrf.mxu0 }
 0x2b6   :  { %v533_v35 = vmul.f32 0.088388346, %v512_v22 }
 0x2b8   :  { %v2534_v16 = vsel %vm538_vm2, %v533_v35, -1e+30 }
 0x2bd   :  { %v515_v60 = vpop.f32.mrf.mxu0 }
 0x2be   :  { %v534_v41 = vmul.f32 0.088388346, %v515_v60 }
 0x2c0   :  { %v2543_v21 = vsel %vm538_vm2, %v534_v41, -1e+30 }
 0x2c4   :  { %v556_v61 = vpop.xlane.xlu0 %555 }
 0x2c5   :  { %v587_v63 = vsub.f32 %v539_v54, %v556_v61  ;;  %v517_v38 = vpop.f32.mrf.mxu0 }
 0x2c7   :  { %v603_v44 = vmul.f32 1.442695, %v587_v63 }
 0x2c9   :  { %1930 = vpow2.f32 %v603_v44 }
 0x2cc   :  { %v558_v57 = vpop.xlane.xlu0 %557 }
 0x2cd   :  { %v588_v39 = vsub.f32 %v540_v45, %v558_v57 }
 0x2cf   :  { %v2494_v1 = vpop.eup %1930  ;;  %v605_v36 = vmul.f32 1.442695, %v588_v39 }
 0x2d0   :  { %635 = vadd.xlane.f32.xlu2 %v2494_v1 }
 0x2d1   :  { %1932 = vpow2.f32 %v605_v36 }
 0x2d4   :  { %v560_v4 = vpop.xlane.xlu1 %559 }
 0x2d5   :  { %v589_v5 = vsub.f32 %v541_v25, %v560_v4 }
 0x2d7   :  { %v2497_v51 = vpop.eup %1932  ;;  %v607_v43 = vmul.f32 1.442695, %v589_v5 }
 0x2d8   :  { %637 = vadd.xlane.f32.xlu0 %v2497_v51  ;;  %573 = vmax.xlane.f32.xlu2 %v2501_v6 }
 0x2d9   :  { %1934 = vpow2.f32 %v607_v43 }
 0x2dc   :  { %v562_v11 = vpop.xlane.xlu1 %561 }
 0x2dd   :  { %v590_v8 = vsub.f32 %v542_v34, %v562_v11 }
 0x2df   :  { %v2505_v18 = vpop.eup %1934  ;;  %v609_v19 = vmul.f32 1.442695, %v590_v8 }
 0x2e0   :  { %639 = vadd.xlane.f32.xlu0 %v2505_v18  ;;  %575 = vmax.xlane.f32.xlu2 %v2509_v14 }
 0x2e1   :  { %1936 = vpow2.f32 %v609_v19 }
 0x2e4   :  { %v564_v26 = vpop.xlane.xlu2 %563 }
 0x2e5   :  { %v591_v29 = vsub.f32 %v543_v40, %v564_v26  ;;  %v535_v40 = vmul.f32 0.088388346, %v517_v38 }
 0x2e7   :  { %v2513_v27 = vpop.eup %1936  ;;  %v611_v17 = vmul.f32 1.442695, %v591_v29  ;;  %v2552_v48 = vsel %vm538_vm2, %v535_v40, -1e+30  ;;  %v1881_v29 = vld [vmem:[%s3194_s3 + $0x38] sm:$0xff] }
 0x2e8   :  { %641 = vadd.xlane.f32.xlu1 %v2513_v27  ;;  %577 = vmax.xlane.f32.xlu0 %v2517_v20 }
 0x2e9   :  { %1938 = vpow2.f32 %v611_v17  ;;  %837 = vmatpush.bf16.msrb.mxu2 %v1881_v29 }
 0x2ec   :  { %v566_v31 = vpop.xlane.xlu2 %565 }
 0x2ed   :  { %v592_v33 = vsub.f32 %v544_v15, %v566_v31 }
 0x2ef   :  { %v2521_v28 = vpop.eup %1938  ;;  %v613_v3 = vmul.f32 1.442695, %v592_v33 }
 0x2f0   :  { %643 = vadd.xlane.f32.xlu1 %v2521_v28  ;;  %579 = vmax.xlane.f32.xlu0 %v2525_v9 }
 0x2f1   :  { %1940 = vpow2.f32 %v613_v3 }
 0x2f4   :  { %v568_v37 = vpop.xlane.xlu0 %567 }
 0x2f5   :  { %v593_v54 = vsub.f32 %v2481_v49, %v568_v37 }
 0x2f7   :  { %v2530_v62 = vpop.eup %1940  ;;  %v615_v45 = vmul.f32 1.442695, %v593_v54 }
 0x2f8   :  { %645 = vadd.xlane.f32.xlu2 %v2530_v62  ;;  %581 = vmax.xlane.f32.xlu1 %v2534_v16 }
 0x2f9   :  { %1942 = vpow2.f32 %v615_v45 }
 0x2fc   :  { %v570_v25 = vpop.xlane.xlu1 %569 }
 0x2fd   :  { %v594_v30 = vsub.f32 %v2486_v53, %v570_v25 }
 0x2ff   :  { %v2539_v32 = vpop.eup %1942  ;;  %v617_v34 = vmul.f32 1.442695, %v594_v30 }
 0x300   :  { %647 = vadd.xlane.f32.xlu2 %v2539_v32  ;;  %583 = vmax.xlane.f32.xlu1 %v2543_v21 }
 0x301   :  { %1944 = vpow2.f32 %v617_v34 }
 0x304   :  { %v572_v42 = vpop.xlane.xlu1 %571 }
 0x305   :  { %v595_v46 = vsub.f32 %v2491_v58, %v572_v42 }
 0x307   :  { %v2548_v15 = vpop.eup %1944  ;;  %v619_v47 = vmul.f32 1.442695, %v595_v46 }
 0x308   :  { %649 = vadd.xlane.f32.xlu0 %v2548_v15  ;;  %585 = vmax.xlane.f32.xlu2 %v2552_v48 }
 0x309   :  { %1946 = vpow2.f32 %v619_v47 }
 0x30f   :  { %v2556_v49 = vpop.eup %1946 }
 0x310   :  { %651 = vadd.xlane.f32.xlu0 %v2556_v49 }
 0x343   :  { %v636_v13 = vpop.xlane.xlu2 %635 }
 0x344   :  { %1948 = vrcp.f32 %v636_v13  ;;  %v1877_v13 = vld [vmem:[%s3194_s3 + $0x18] sm:$0xff] }
 0x34a   :  { %v1949_v58 = vpop.eup %1948 }
 0x34b   :  { %v638_v52 = vpop.xlane.xlu0 %637  ;;  %v574_v53 = vpop.xlane.xlu2 %573  ;;  %v683_v61 = vmul.f32 %v1949_v58, %v2494_v1 }
 0x34c   :  { %1950 = vrcp.f32 %v638_v52  ;;  %v596_v55 = vsub.f32 %v2501_v6, %v574_v53  ;;  %v1874_v52 = vld [vmem:[%s3194_s3] sm:$0xff] }
 0x34e   :  { %v621_v56 = vmul.f32 1.442695, %v596_v55 }
 0x350   :  { %1952 = vpow2.f32 %v621_v56 }
 0x352   :  { %v1951_v59 = vpop.eup %1950 }
 0x353   :  { %v684_v63 = vmul.f32 %v1951_v59, %v2497_v51  ;;  %v640_v44 = vpop.xlane.xlu0 %639  ;;  %v576_v57 = vpop.xlane.xlu2 %575 }
 0x354   :  { %v597_v39 = vsub.f32 %v2509_v14, %v576_v57 }
 0x355   :  { %v699_v0 = vpack.c.bf16 %v684_v63, %v683_v61 }
 0x356   :  { %v2563_v36 = vpop.eup %1952  ;;  %v623_v2 = vmul.f32 1.442695, %v597_v39 }
 0x357   :  { %723 = vmatmul.bf16.vlgmr.msra.gmra.mxu1 %v699_v0  ;;  %653 = vadd.xlane.f32.xlu1 %v2563_v36 }
 0x358   :  { %1954 = vpow2.f32 %v623_v2 }
 0x359   :  { %1956 = vrcp.f32 %v640_v44 }
 0x35b   :  { %v642_v4 = vpop.xlane.xlu1 %641  ;;  %v578_v5 = vpop.xlane.xlu0 %577 }
 0x35c   :  { %1958 = vrcp.f32 %v642_v4  ;;  %v598_v1 = vsub.f32 %v2517_v20, %v578_v5 }
 0x35e   :  { %v2567_v43 = vpop.eup %1954  ;;  %v625_v51 = vmul.f32 1.442695, %v598_v1 }
 0x35f   :  { %655 = vadd.xlane.f32.xlu2 %v2567_v43  ;;  %v1957_v6 = vpop.eup %1956 }
 0x360   :  { %1960 = vpow2.f32 %v625_v51  ;;  %v685_v8 = vmul.f32 %v1957_v6, %v2505_v18  ;;  %v1880_v18 = vld [vmem:[%s3194_s3 + $0x30] sm:$0xff] }
 0x361   :  { %838 = vmatpush.bf16.msrb.mxu2 %v1880_v18 }
 0x362   :  { %v1959_v7 = vpop.eup %1958 }
 0x363   :  { %v644_v10 = vpop.xlane.xlu1 %643  ;;  %v580_v11 = vpop.xlane.xlu0 %579  ;;  %v686_v19 = vmul.f32 %v1959_v7, %v2513_v27 }
 0x364   :  { %v599_v14 = vsub.f32 %v2525_v9, %v580_v11 }
 0x365   :  { %v700_v23 = vpack.c.bf16 %v686_v19, %v685_v8  ;;  %839 = vmatpush.bf16.msrb.mxu2 %v1879_v50  ;;  %v1780_v19 = vld [vmem:[%s3195_s4 + $0x70] sm:$0xf] }
 0x366   :  { %v2573_v24 = vpop.eup %1960  ;;  %v627_v26 = vmul.f32 1.442695, %v599_v14  ;;  %v1896_v14 = vld [vmem:[%s3195_s4 + $0x74] sm:$0xf] }
 0x367   :  { %728 = vmatmul.bf16.gmra.mxu1 %v700_v23  ;;  %657 = vadd.xlane.f32.xlu0 %v2573_v24 }
 0x368   :  { %1962 = vpow2.f32 %v627_v26 }
 0x369   :  { %1964 = vrcp.f32 %v644_v10 }
 0x36b   :  { %v646_v27 = vpop.xlane.xlu2 %645  ;;  %v582_v17 = vpop.xlane.xlu1 %581 }
 0x36c   :  { %1966 = vrcp.f32 %v646_v27  ;;  %v600_v20 = vsub.f32 %v2534_v16, %v582_v17 }
 0x36e   :  { %v2586_v22 = vpop.eup %1962  ;;  %v629_v31 = vmul.f32 1.442695, %v600_v20 }
 0x36f   :  { %659 = vadd.xlane.f32.xlu1 %v2586_v22  ;;  %v1965_v33 = vpop.eup %1964 }
 0x370   :  { %1968 = vpow2.f32 %v629_v31  ;;  %v687_v37 = vmul.f32 %v1965_v33, %v2521_v28 }
 0x372   :  { %v1967_v3 = vpop.eup %1966 }
 0x373   :  { %v648_v9 = vpop.xlane.xlu2 %647  ;;  %v584_v35 = vpop.xlane.xlu1 %583  ;;  %v688_v54 = vmul.f32 %v1967_v3, %v2530_v62 }
 0x374   :  { %v601_v60 = vsub.f32 %v2543_v21, %v584_v35 }
 0x375   :  { %v701_v45 = vpack.c.bf16 %v688_v54, %v687_v37 }
 0x376   :  { %v2592_v16 = vpop.eup %1968  ;;  %v631_v41 = vmul.f32 1.442695, %v601_v60 }
 0x377   :  { %733 = vmatmul.bf16.gmra.mxu1 %v701_v45  ;;  %661 = vadd.xlane.f32.xlu2 %v2592_v16 }
 0x378   :  { %1970 = vpow2.f32 %v631_v41  ;;  %v1772_v41 = vld [vmem:[%s3195_s4 + $0x60] sm:$0xf] }
 0x379   :  { %1972 = vrcp.f32 %v648_v9 }
 0x37b   :  { %v650_v25 = vpop.xlane.xlu0 %649  ;;  %v586_v30 = vpop.xlane.xlu2 %585 }
 0x37c   :  { %1974 = vrcp.f32 %v650_v25  ;;  %v602_v34 = vsub.f32 %v2552_v48, %v586_v30  ;;  %v1878_v48 = vld [vmem:[%s3194_s3 + $0x20] sm:$0xff]  ;;  %v1895_v25 = vld [vmem:[%s3195_s4 + $0x64] sm:$0xf0] }
 0x37d   :  { %840 = vmatpush.bf16.msrb.mxu2 %v1878_v48  ;;  %v1894_v30 = vld [vmem:[%s3195_s4 + $0x64] sm:$0xf]  ;;  %v1756_v48 = vld [vmem:[%s3195_s4 + $0x40] sm:$0xf] }
 0x37e   :  { %v2596_v38 = vpop.eup %1970  ;;  %v633_v28 = vmul.f32 1.442695, %v602_v34  ;;  %v1773_v34 = vor.u32 %v1895_v25, %v1772_v41  ;;  %v1912_v41 = vld [vmem:[%s3196_s5 + $0x70] sm:$0xff] }
 0x37f   :  { %663 = vadd.xlane.f32.xlu0 %v2596_v38  ;;  %v1973_v62 = vpop.eup %1972 }
 0x380   :  { %1976 = vpow2.f32 %v633_v28  ;;  %v689_v40 = vmul.f32 %v1973_v62, %v2539_v32  ;;  %v1876_v32 = vld [vmem:[%s3194_s3 + $0x10] sm:$0xff] }
 0x381   :  { %841 = vmatpush.bf16.msrb.mxu2 %v1877_v13  ;;  %v1764_v62 = vld [vmem:[%s3195_s4 + $0x50] sm:$0xf]  ;;  %v1891_v13 = vld [vmem:[%s3195_s4 + $0x44] sm:$0xf0] }
 0x382   :  { %v1975_v21 = vpop.eup %1974 }
 0x383   :  { %v690_v42 = vmul.f32 %v1975_v21, %v2548_v15  ;;  %v1875_v15 = vld [vmem:[%s3194_s3 + $0x8] sm:$0xff]  ;;  %v652_v53 = vpop.xlane.xlu0 %651  ;;  %v1893_v21 = vld [vmem:[%s3195_s4 + $0x54] sm:$0xf0] }
 0x384   :  { %1978 = vrcp.f32 %v652_v53 }
 0x385   :  { %v702_v46 = vpack.c.bf16 %v690_v42, %v689_v40  ;;  %842 = vmatpush.bf16.msrb.mxu2 %v1876_v32  ;;  %v1892_v40 = vld [vmem:[%s3195_s4 + $0x54] sm:$0xf]  ;;  %v1765_v42 = vor.u32 %v1893_v21, %v1764_v62  ;;  %v1890_v32 = vld [vmem:[%s3195_s4 + $0x44] sm:$0xf] }
 0x386   :  { %v2601_v47 = vpop.eup %1976 }
 0x387   :  { %738 = vmatmul.bf16.gmra.mxu1 %v702_v46  ;;  %665 = vadd.xlane.f32.xlu1 %v2601_v47  ;;  %v1766_v46 = vld [vmem:[%s3195_s4 + $0x58] sm:$0xf0] }
 0x389   :  { %843 = vmatpush.bf16.msrb.mxu2 %v1875_v15  ;;  %v1757_v15 = vor.u32 %v1891_v13, %v1756_v48 }
 0x38a   :  { %v1979_v56 = vpop.eup %1978 }
 0x38b   :  { %v691_v59 = vmul.f32 %v1979_v56, %v2556_v49  ;;  %v1889_v56 = vld [vmem:[%s3195_s4 + $0x34] sm:$0xf0] }
 0x38d   :  { %844 = vmatpush.bf16.msrb.mxu2 %v1874_v52  ;;  %v1758_v52 = vld [vmem:[%s3195_s4 + $0x48] sm:$0xf0] }
 0x38e   :  { %v1761_v53 = vor.u32 %v1890_v32, %v1758_v52  ;;  %v1905_v32 = vld [vmem:[%s3196_s5 + $0x38] sm:$0xff]  ;;  %v1904_v52 = vld [vmem:[%s3196_s5 + $0x30] sm:$0xff] }
 0x38f   :  { %1272 = vmatpush.bf16.msrb.mxu1 %v1905_v32 }
 0x393   :  { %1273 = vmatpush.bf16.msrb.mxu1 %v1904_v52 }
 0x3ca   :  { %v654_v55 = vpop.xlane.xlu1 %653 }
 0x3cb   :  { %1980 = vrcp.f32 %v654_v55  ;;  %v1748_v55 = vld [vmem:[%s3195_s4 + $0x30] sm:$0xf] }
 0x3d1   :  { %v1981_v58 = vpop.eup %1980 }
 0x3d2   :  { %v692_v61 = vmul.f32 %v1981_v58, %v2563_v36  ;;  %v656_v57 = vpop.xlane.xlu2 %655  ;;  %v1888_v58 = vld [vmem:[%s3195_s4 + $0x34] sm:$0xf] }
 0x3d3   :  { %1982 = vrcp.f32 %v656_v57  ;;  %v1887_v57 = vld [vmem:[%s3195_s4 + $0x24] sm:$0xf0] }
 0x3d4   :  { %v724_v63 = vpop.f32.mrf.mxu1  ;;  %v703_v44 = vpack.c.bf16 %v692_v61, %v691_v59  ;;  %v1749_v59 = vor.u32 %v1889_v56, %v1748_v55  ;;  %v1750_v61 = vld [vmem:[%s3195_s4 + $0x38] sm:$0xf0]  ;;  %v1903_v55 = vld [vmem:[%s3196_s5 + $0x28] sm:$0xff] }
 0x3d5   :  { %1274 = vmatpush.bf16.msrb.mxu1 %v1903_v55  ;;  %v1909_v56 = vld [vmem:[%s3196_s5 + $0x58] sm:$0xff] }
 0x3d6   :  { %743 = vmatmul.bf16.gmra.mxu1 %v703_v44  ;;  %v1740_v44 = vld [vmem:[%s3195_s4 + $0x20] sm:$0xf] }
 0x3d9   :  { %v1983_v4 = vpop.eup %1982 }
 0x3da   :  { %v658_v39 = vpop.xlane.xlu0 %657  ;;  %v693_v1 = vmul.f32 %v1983_v4, %v2567_v43  ;;  %v1897_v43 = vld [vmem:[%s3195_s4 + $0x74] sm:$0xf0] }
 0x3db   :  { %1984 = vrcp.f32 %v658_v39  ;;  %v1781_v23 = vor.u32 %v1897_v43, %v1780_v19  ;;  %v1886_v39 = vld [vmem:[%s3195_s4 + $0x24] sm:$0xf]  ;;  %v1726_v19 = vld [vmem:[%s3195_s4 + $0x8] sm:$0xf0] }
 0x3dc   :  { %v726_v0 = vpop.f32.mrf.mxu1 }
 0x3dd   :  { %v764_v2 = vpack.c.bf16 %v726_v0, %v724_v63  ;;  %997 = vmatpush.bf16.msra.mxu3 %v1781_v23  ;;  %v1753_v63 = vor.u32 %v1888_v58, %v1750_v61  ;;  %v1741_v0 = vor.u32 %v1887_v57, %v1740_v44  ;;  %v1902_v58 = vld [vmem:[%s3196_s5 + $0x20] sm:$0xff]  ;;  %v1901_v61 = vld [vmem:[%s3196_s5 + $0x18] sm:$0xff]  ;;  %v1900_v44 = vld [vmem:[%s3196_s5 + $0x10] sm:$0xff] }
 0x3de   :  { %1275 = vmatpush.bf16.msrb.mxu1 %v1902_v58  ;;  %v1906_v57 = vld [vmem:[%s3196_s5 + $0x40] sm:$0xff] }
 0x3df   :  { %845 = vmatmul.bf16.vlgmr.msrb.gmra.mxu2 %v764_v2  ;;  %v1742_v2 = vld [vmem:[%s3195_s4 + $0x28] sm:$0xf0] }
 0x3e0   :  { %v1745_v4 = vor.u32 %v1886_v39, %v1742_v2  ;;  %v1899_v39 = vld [vmem:[%s3196_s5 + $0x8] sm:$0xff] }
 0x3e1   :  { %v1985_v5 = vpop.eup %1984  ;;  %998 = vmatpush.bf16.msra.mxu3 %v1773_v34 }
 0x3e2   :  { %v694_v51 = vmul.f32 %v1985_v5, %v2573_v24  ;;  %v660_v7 = vpop.xlane.xlu1 %659  ;;  %v1782_v24 = vld [vmem:[%s3195_s4 + $0x78] sm:$0xf0]  ;;  %v1732_v5 = vld [vmem:[%s3195_s4 + $0x10] sm:$0xf]  ;;  %1276 = vmatpush.bf16.msrb.mxu1 %v1901_v61 }
 0x3e3   :  { %1986 = vrcp.f32 %v660_v7  ;;  %v1785_v29 = vor.u32 %v1896_v14, %v1782_v24 }
 0x3e4   :  { %v729_v6 = vpop.f32.mrf.mxu1  ;;  %v704_v49 = vpack.c.bf16 %v694_v51, %v693_v1  ;;  %v1885_v1 = vld [vmem:[%s3195_s4 + $0x14] sm:$0xf0]  ;;  %v1884_v51 = vld [vmem:[%s3195_s4 + $0x14] sm:$0xf] }
 0x3e5   :  { %1046 = vmatpush.bf16.msra.mxu0 %v1785_v29  ;;  %999 = vmatpush.bf16.msra.mxu3 %v1765_v42 }
 0x3e6   :  { %748 = vmatmul.bf16.gmra.mxu1 %v704_v49  ;;  %v1734_v49 = vld [vmem:[%s3195_s4 + $0x18] sm:$0xf0] }
 0x3e7   :  { %v1737_v7 = vor.u32 %v1884_v51, %v1734_v49  ;;  %1277 = vmatpush.bf16.msrb.mxu1 %v1900_v44  ;;  %v1721_v51 = vld [vmem:[%s3193_s6 + $0x3] ss:$8 sm:$0x3] }
 0x3e9   :  { %v1987_v8 = vpop.eup %1986  ;;  %1000 = vmatpush.bf16.msra.mxu3 %v1757_v15  ;;  %v1911_v15 = vld [vmem:[%s3196_s5 + $0x68] sm:$0xff] }
 0x3ea   :  { %v662_v36 = vpop.xlane.xlu2 %661  ;;  %v695_v18 = vmul.f32 %v1987_v8, %v2586_v22 }
 0x3eb   :  { %1988 = vrcp.f32 %v662_v36  ;;  %v1724_v36 = vld [vmem:[%s3195_s4] sm:$0xf]  ;;  %1278 = vmatpush.bf16.msrb.mxu1 %v1899_v39 }
 0x3ec   :  { %v731_v10 = vpop.f32.mrf.mxu1 }
 0x3ed   :  { %v765_v11 = vpack.c.bf16 %v731_v10, %v729_v6  ;;  %1001 = vmatpush.bf16.msra.mxu3 %v1749_v59  ;;  %v1733_v6 = vor.u32 %v1885_v1, %v1732_v5  ;;  %v1883_v10 = vld [vmem:[%s3195_s4 + $0x4] sm:$0xf0]  ;;  %v1908_v59 = vld [vmem:[%s3196_s5 + $0x50] sm:$0xff] }
 0x3ee   :  { %v1725_v8 = vor.u32 %v1883_v10, %v1724_v36 }
 0x3ef   :  { %850 = vmatmul.bf16.gmra.mxu2 %v765_v11  ;;  %v1882_v11 = vld [vmem:[%s3195_s4 + $0x4] sm:$0xf] }
 0x3f0   :  { %v1729_v43 = vor.u32 %v1882_v11, %v1726_v19  ;;  %v2792_v19 = vperm.slane %v1721_v51, 0 }
 0x3f1   :  { %v1989_v26 = vpop.eup %1988  ;;  %1002 = vmatpush.bf16.msra.mxu3 %v1741_v0  ;;  %v1898_v0 = vld [vmem:[%s3196_s5] sm:$0xff] }
 0x3f2   :  { %v696_v27 = vmul.f32 %v1989_v26, %v2592_v16  ;;  %v664_v50 = vpop.xlane.xlu0 %663  ;;  %1279 = vmatpush.bf16.msrb.mxu1 %v1898_v0 }
 0x3f3   :  { %1990 = vrcp.f32 %v664_v50 }
 0x3f4   :  { %v734_v17 = vpop.f32.mrf.mxu1  ;;  %v705_v20 = vpack.c.bf16 %v696_v27, %v695_v18  ;;  %v2726_v18 = vld [vmem:[%s3193_s6 + $0x2] ss:$0 sm:$0xff] }
 0x3f5   :  { %1003 = vmatpush.bf16.msra.mxu3 %v1733_v6 }
 0x3f6   :  { %753 = vmatmul.bf16.gmra.mxu1 %v705_v20 }
 0x3f9   :  { %v1991_v9 = vpop.eup %1990  ;;  %1004 = vmatpush.bf16.msra.mxu3 %v1725_v8 }
 0x3fa   :  { %v666_v31 = vpop.xlane.xlu1 %665  ;;  %v697_v37 = vmul.f32 %v1991_v9, %v2596_v38  ;;  %v1774_v38 = vld [vmem:[%s3195_s4 + $0x68] sm:$0xf0] }
 0x3fb   :  { %1992 = vrcp.f32 %v666_v31  ;;  %v1777_v28 = vor.u32 %v1894_v30, %v1774_v38 }
 0x3fc   :  { %v736_v33 = vpop.f32.mrf.mxu1 }
 0x3fd   :  { %v766_v3 = vpack.c.bf16 %v736_v33, %v734_v17  ;;  %1047 = vmatpush.bf16.msra.mxu0 %v1777_v28 }
 0x3ff   :  { %855 = vmatmul.bf16.gmra.mxu2 %v766_v3 }
 0x401   :  { %v1993_v35 = vpop.eup %1992 }
 0x402   :  { %v698_v22 = vmul.f32 %v1993_v35, %v2601_v47  ;;  %v1769_v47 = vor.u32 %v1892_v40, %v1766_v46 }
 0x404   :  { %v739_v54 = vpop.f32.mrf.mxu1  ;;  %v706_v60 = vpack.c.bf16 %v698_v22, %v697_v37  ;;  %1048 = vmatpush.bf16.msra.mxu0 %v1769_v47 }
 0x406   :  { %758 = vmatmul.bf16.gmra.mxu1 %v706_v60 }
 0x408   :  { %1049 = vmatpush.bf16.msra.mxu0 %v1761_v53  ;;  %v1910_v53 = vld [vmem:[%s3196_s5 + $0x60] sm:$0xff] }
 0x40c   :  { %v741_v45 = vpop.f32.mrf.mxu1  ;;  %1050 = vmatpush.bf16.msra.mxu0 %v1753_v63  ;;  %v1907_v63 = vld [vmem:[%s3196_s5 + $0x48] sm:$0xff] }
 0x40d   :  { %v767_v16 = vpack.c.bf16 %v741_v45, %v739_v54 }
 0x40f   :  { %860 = vmatmul.bf16.gmra.mxu2 %v767_v16  ;;  %v1913_v16 = vld [vmem:[%s3196_s5 + $0x78] sm:$0xff] }
 0x410   :  { %1051 = vmatpush.bf16.msra.mxu0 %v1745_v4  ;;  %1321 = vmatpush.bf16.msra.mxu2 %v1913_v16 }
 0x414   :  { %1052 = vmatpush.bf16.msra.mxu0 %v1737_v7  ;;  %1322 = vmatpush.bf16.msra.mxu2 %v1912_v41  ;;  %v2789_v7 = vperm.slane %v1721_v51, 1 }
 0x418   :  { %1053 = vmatpush.bf16.msra.mxu0 %v1729_v43  ;;  %1323 = vmatpush.bf16.msra.mxu2 %v1911_v15 }
 0x41c   :  { %1324 = vmatpush.bf16.msra.mxu2 %v1910_v53 }
 0x420   :  { %1325 = vmatpush.bf16.msra.mxu2 %v1909_v56 }
 0x424   :  { %1326 = vmatpush.bf16.msra.mxu2 %v1908_v59 }
 0x428   :  { %1327 = vmatpush.bf16.msra.mxu2 %v1907_v63 }
 0x42c   :  { %1328 = vmatpush.bf16.msra.mxu2 %v1906_v57 }
 0x453   :  { %v744_v14 = vpop.f32.mrf.mxu1 }
 0x45b   :  { %v746_v23 = vpop.f32.mrf.mxu1 }
 0x45c   :  { %v768_v24 = vpack.c.bf16 %v746_v23, %v744_v14 }
 0x45e   :  { %865 = vmatmul.bf16.gmra.mxu2 %v768_v24 }
 0x462   :  { %v846_v26 = vpop.f32.mrf.mxu2 }
 0x463   :  { %v749_v29 = vpop.f32.mrf.mxu1  ;;  %v847_v17 = vadd.f32 %v846_v26, %v2726_v18 }
 0x46a   :  { %v848_v27 = vpop.f32.mrf.mxu2 }
 0x46b   :  { %v849_v20 = vadd.f32 %v848_v27, %v2726_v18  ;;  %v751_v50 = vpop.f32.mrf.mxu1 }
 0x46c   :  { %v769_v31 = vpack.c.bf16 %v751_v50, %v749_v29 }
 0x46d   :  { %v886_v33 = vpack.c.bf16 %v849_v20, %v847_v17 }
 0x46e   :  { %870 = vmatmul.bf16.gmra.mxu2 %v769_v31 }
 0x46f   :  { %1005 = vmatmul.bf16.vlgmr.msra.gmra.mxu3 %v886_v33  ;;  %1054 = vmatmul.bf16.vlgmr.msra.gmra.mxu0 %v886_v33 }
 0x472   :  { %v851_v3 = vpop.f32.mrf.mxu2 }
 0x473   :  { %v754_v9 = vpop.f32.mrf.mxu1  ;;  %v852_v37 = vadd.f32 %v851_v3, %v2726_v18 }
 0x47a   :  { %v853_v35 = vpop.f32.mrf.mxu2 }
 0x47b   :  { %v854_v22 = vadd.f32 %v853_v35, %v2726_v18  ;;  %v756_v54 = vpop.f32.mrf.mxu1 }
 0x47c   :  { %v770_v60 = vpack.c.bf16 %v756_v54, %v754_v9 }
 0x47d   :  { %v887_v45 = vpack.c.bf16 %v854_v22, %v852_v37 }
 0x47e   :  { %875 = vmatmul.bf16.gmra.mxu2 %v770_v60 }
 0x47f   :  { %1010 = vmatmul.bf16.gmra.mxu3 %v887_v45  ;;  %1059 = vmatmul.bf16.gmra.mxu0 %v887_v45 }
 0x482   :  { %v856_v25 = vpop.f32.mrf.mxu2 }
 0x483   :  { %v759_v30 = vpop.f32.mrf.mxu1  ;;  %v857_v38 = vadd.f32 %v856_v25, %v2726_v18 }
 0x48a   :  { %v858_v34 = vpop.f32.mrf.mxu2 }
 0x48b   :  { %v859_v28 = vadd.f32 %v858_v34, %v2726_v18  ;;  %v761_v62 = vpop.f32.mrf.mxu1 }
 0x48c   :  { %v771_v21 = vpack.c.bf16 %v761_v62, %v759_v30 }
 0x48d   :  { %v888_v40 = vpack.c.bf16 %v859_v28, %v857_v38 }
 0x48e   :  { %880 = vmatmul.bf16.gmra.mxu2 %v771_v21 }
 0x48f   :  { %1015 = vmatmul.bf16.gmra.mxu3 %v888_v40  ;;  %1064 = vmatmul.bf16.gmra.mxu0 %v888_v40 }
 0x492   :  { %v861_v42 = vpop.f32.mrf.mxu2 }
 0x493   :  { %v862_v47 = vadd.f32 %v861_v42, %v2726_v18 }
 0x49a   :  { %v863_v46 = vpop.f32.mrf.mxu2 }
 0x49b   :  { %v864_v48 = vadd.f32 %v863_v46, %v2726_v18 }
 0x49d   :  { %v889_v13 = vpack.c.bf16 %v864_v48, %v862_v47 }
 0x49f   :  { %1020 = vmatmul.bf16.gmra.mxu3 %v889_v13  ;;  %1069 = vmatmul.bf16.gmra.mxu0 %v889_v13 }
 0x4e1   :  { %v866_v2 = vpop.f32.mrf.mxu2 }
 0x4e2   :  { %v867_v5 = vadd.f32 %v866_v2, %v2726_v18 }
 0x4e9   :  { %v868_v4 = vpop.f32.mrf.mxu2 }
 0x4ea   :  { %v869_v1 = vadd.f32 %v868_v4, %v2726_v18 }
 0x4ec   :  { %v890_v6 = vpack.c.bf16 %v869_v1, %v867_v5  ;;  %v1055_v49 = vpop.f32.mrf.mxu0 }
 0x4ed   :  { %v1056_v11 = vadd.f32 %v1055_v49, %v2789_v7 }
 0x4ee   :  { %1025 = vmatmul.bf16.gmra.mxu3 %v890_v6  ;;  %1074 = vmatmul.bf16.gmra.mxu0 %v890_v6 }
 0x4ef   :  { %v1096_v14 = vmax.f32 %v1056_v11, 0.0 }
 0x4f1   :  { %v871_v36 = vpop.f32.mrf.mxu2 }
 0x4f2   :  { %v1006_v10 = vpop.f32.mrf.mxu3  ;;  %v872_v27 = vadd.f32 %v871_v36, %v2726_v18 }
 0x4f3   :  { %v1007_v24 = vadd.f32 %v1006_v10, %v2792_v19 }
 0x4f4   :  { %v1057_v8 = vpop.f32.mrf.mxu0 }
 0x4f5   :  { %v1058_v43 = vadd.f32 %v1057_v8, %v2789_v7  ;;  %v1095_v3 = vmax.f32 %v1007_v24, 0.0 }
 0x4f7   :  { %v1098_v23 = vmax.f32 %v1058_v43, 0.0 }
 0x4f9   :  { %v1128_v26 = vpack.c.bf16 %v1098_v23, %v1096_v14  ;;  %v873_v29 = vpop.f32.mrf.mxu2 }
 0x4fa   :  { %v874_v17 = vadd.f32 %v873_v29, %v2726_v18  ;;  %v1008_v20 = vpop.f32.mrf.mxu3 }
 0x4fb   :  { %v1009_v50 = vadd.f32 %v1008_v20, %v2792_v19  ;;  %1329 = vmatmul.bf16.vlgmr.msra.gmra.mxu2 %v1128_v26 }
 0x4fc   :  { %v891_v31 = vpack.c.bf16 %v874_v17, %v872_v27  ;;  %v1060_v33 = vpop.f32.mrf.mxu0 }
 0x4fd   :  { %v1097_v9 = vmax.f32 %v1009_v50, 0.0  ;;  %v1061_v54 = vadd.f32 %v1060_v33, %v2789_v7 }
 0x4fe   :  { %1030 = vmatmul.bf16.gmra.mxu3 %v891_v31  ;;  %1079 = vmatmul.bf16.gmra.mxu0 %v891_v31 }
 0x4ff   :  { %v1127_v35 = vpack.c.bf16 %v1097_v9, %v1095_v3  ;;  %v1100_v16 = vmax.f32 %v1061_v54, 0.0 }
 0x501   :  { %v876_v37 = vpop.f32.mrf.mxu2  ;;  %1280 = vmatmul.bf16.vlgmr.msrb.gmra.mxu1 %v1127_v35 }
 0x502   :  { %v1011_v22 = vpop.f32.mrf.mxu3  ;;  %v877_v38 = vadd.f32 %v876_v37, %v2726_v18 }
 0x503   :  { %v1012_v25 = vadd.f32 %v1011_v22, %v2792_v19 }
 0x504   :  { %v1062_v60 = vpop.f32.mrf.mxu0 }
 0x505   :  { %v1063_v45 = vadd.f32 %v1062_v60, %v2789_v7  ;;  %v1099_v46 = vmax.f32 %v1012_v25, 0.0 }
 0x507   :  { %v1102_v41 = vmax.f32 %v1063_v45, 0.0  ;;  %v2822_v45 = vld [vmem:[%s3193_s6 + $0x4] ss:$0 sm:$0xff] }
 0x509   :  { %v1130_v30 = vpack.c.bf16 %v1102_v41, %v1100_v16  ;;  %v878_v34 = vpop.f32.mrf.mxu2 }
 0x50a   :  { %v879_v28 = vadd.f32 %v878_v34, %v2726_v18  ;;  %v1013_v62 = vpop.f32.mrf.mxu3 }
 0x50b   :  { %v1014_v21 = vadd.f32 %v1013_v62, %v2792_v19  ;;  %1334 = vmatmul.bf16.gmra.mxu2 %v1130_v30 }
 0x50c   :  { %v892_v40 = vpack.c.bf16 %v879_v28, %v877_v38  ;;  %v1065_v42 = vpop.f32.mrf.mxu0 }
 0x50d   :  { %v1101_v47 = vmax.f32 %v1014_v21, 0.0  ;;  %v1066_v15 = vadd.f32 %v1065_v42, %v2789_v7 }
 0x50e   :  { %1035 = vmatmul.bf16.gmra.mxu3 %v892_v40  ;;  %1084 = vmatmul.bf16.gmra.mxu0 %v892_v40 }
 0x50f   :  { %v1129_v48 = vpack.c.bf16 %v1101_v47, %v1099_v46  ;;  %v1104_v55 = vmax.f32 %v1066_v15, 0.0 }
 0x511   :  { %v881_v13 = vpop.f32.mrf.mxu2  ;;  %1285 = vmatmul.bf16.gmra.mxu1 %v1129_v48 }
 0x512   :  { %v1016_v32 = vpop.f32.mrf.mxu3  ;;  %v882_v63 = vadd.f32 %v881_v13, %v2726_v18 }
 0x513   :  { %v1017_v58 = vadd.f32 %v1016_v32, %v2792_v19 }
 0x514   :  { %v1067_v52 = vpop.f32.mrf.mxu0 }
 0x515   :  { %v1068_v53 = vadd.f32 %v1067_v52, %v2789_v7  ;;  %v1103_v4 = vmax.f32 %v1017_v58, 0.0 }
 0x517   :  { %v1106_v56 = vmax.f32 %v1068_v53, 0.0 }
 0x519   :  { %v1132_v59 = vpack.c.bf16 %v1106_v56, %v1104_v55  ;;  %v883_v61 = vpop.f32.mrf.mxu2 }
 0x51a   :  { %v884_v44 = vadd.f32 %v883_v61, %v2726_v18  ;;  %v1018_v57 = vpop.f32.mrf.mxu3 }
 0x51b   :  { %v1019_v39 = vadd.f32 %v1018_v57, %v2792_v19  ;;  %1339 = vmatmul.bf16.gmra.mxu2 %v1132_v59 }
 0x51c   :  { %v893_v0 = vpack.c.bf16 %v884_v44, %v882_v63  ;;  %v1070_v2 = vpop.f32.mrf.mxu0 }
 0x51d   :  { %v1105_v5 = vmax.f32 %v1019_v39, 0.0  ;;  %v1071_v6 = vadd.f32 %v1070_v2, %v2789_v7 }
 0x51e   :  { %1040 = vmatmul.bf16.gmra.mxu3 %v893_v0  ;;  %1089 = vmatmul.bf16.gmra.mxu0 %v893_v0 }
 0x51f   :  { %v1131_v1 = vpack.c.bf16 %v1105_v5, %v1103_v4  ;;  %v1108_v10 = vmax.f32 %v1071_v6, 0.0 }
 0x521   :  { %1290 = vmatmul.bf16.gmra.mxu1 %v1131_v1 }
 0x522   :  { %v1021_v51 = vpop.f32.mrf.mxu3 }
 0x523   :  { %v1022_v11 = vadd.f32 %v1021_v51, %v2792_v19 }
 0x524   :  { %v1072_v49 = vpop.f32.mrf.mxu0 }
 0x525   :  { %v1073_v36 = vadd.f32 %v1072_v49, %v2789_v7  ;;  %v1107_v23 = vmax.f32 %v1022_v11, 0.0 }
 0x527   :  { %v1110_v18 = vmax.f32 %v1073_v36, 0.0 }
 0x529   :  { %v1134_v8 = vpack.c.bf16 %v1110_v18, %v1108_v10 }
 0x52a   :  { %v1023_v43 = vpop.f32.mrf.mxu3 }
 0x52b   :  { %v1024_v14 = vadd.f32 %v1023_v43, %v2792_v19  ;;  %1344 = vmatmul.bf16.gmra.mxu2 %v1134_v8 }
 0x52d   :  { %v1109_v24 = vmax.f32 %v1024_v14, 0.0 }
 0x52f   :  { %v1133_v26 = vpack.c.bf16 %v1109_v24, %v1107_v23 }
 0x531   :  { %1295 = vmatmul.bf16.gmra.mxu1 %v1133_v26 }
 0x56b   :  { %v1075_v29 = vpop.f32.mrf.mxu0 }
 0x56c   :  { %v1076_v17 = vadd.f32 %v1075_v29, %v2789_v7 }
 0x56e   :  { %v1112_v31 = vmax.f32 %v1076_v17, 0.0 }
 0x571   :  { %v1026_v27 = vpop.f32.mrf.mxu3 }
 0x572   :  { %v1027_v3 = vadd.f32 %v1026_v27, %v2792_v19 }
 0x573   :  { %v1077_v20 = vpop.f32.mrf.mxu0 }
 0x574   :  { %v1078_v50 = vadd.f32 %v1077_v20, %v2789_v7  ;;  %v1111_v54 = vmax.f32 %v1027_v3, 0.0 }
 0x576   :  { %v1114_v33 = vmax.f32 %v1078_v50, 0.0 }
 0x578   :  { %v1136_v9 = vpack.c.bf16 %v1114_v33, %v1112_v31 }
 0x579   :  { %v1028_v35 = vpop.f32.mrf.mxu3 }
 0x57a   :  { %v1029_v37 = vadd.f32 %v1028_v35, %v2792_v19  ;;  %1349 = vmatmul.bf16.gmra.mxu2 %v1136_v9 }
 0x57b   :  { %v1080_v22 = vpop.f32.mrf.mxu0 }
 0x57c   :  { %v1113_v60 = vmax.f32 %v1029_v37, 0.0  ;;  %v1081_v28 = vadd.f32 %v1080_v22, %v2789_v7 }
 0x57e   :  { %v1135_v16 = vpack.c.bf16 %v1113_v60, %v1111_v54  ;;  %v1281_v41 = vpop.f32.mrf.mxu1  ;;  %v1330_v25 = vpop.f32.mrf.mxu2  ;;  %v1116_v42 = vmax.f32 %v1081_v28, 0.0 }
 0x57f   :  { %v1282_v30 = vadd.f32 %v1281_v41, %v2822_v45 }
 0x580   :  { %1300 = vmatmul.bf16.gmra.mxu1 %v1135_v16 }
 0x581   :  { %v2826_v34 = vadd.f32 %v1330_v25, %v1282_v30  ;;  %v1031_v38 = vpop.f32.mrf.mxu3 }
 0x582   :  { %v1032_v32 = vadd.f32 %v1031_v38, %v2792_v19 }
 0x583   :  { %v1082_v62 = vpop.f32.mrf.mxu0  ;;  %v2832_v21 = vsel %vm1370_vm3, %v2826_v34, -1e+30 }
 0x584   :  { %v1083_v40 = vadd.f32 %v1082_v62, %v2789_v7  ;;  %1387 = vmax.xlane.f32.xlu2 %v2832_v21  ;;  %v1115_v59 = vmax.f32 %v1032_v32, 0.0 }
 0x586   :  { %v1118_v46 = vmax.f32 %v1083_v40, 0.0  ;;  %v1283_v47 = vpop.f32.mrf.mxu1  ;;  %v1332_v48 = vpop.f32.mrf.mxu2 }
 0x587   :  { %v1284_v13 = vadd.f32 %v1283_v47, %v2822_v45 }
 0x588   :  { %v1138_v15 = vpack.c.bf16 %v1118_v46, %v1116_v42 }
 0x589   :  { %v2838_v52 = vadd.f32 %v1332_v48, %v1284_v13  ;;  %v1033_v53 = vpop.f32.mrf.mxu3 }
 0x58a   :  { %v1034_v55 = vadd.f32 %v1033_v53, %v2792_v19  ;;  %1354 = vmatmul.bf16.gmra.mxu2 %v1138_v15 }
 0x58b   :  { %v1085_v56 = vpop.f32.mrf.mxu0  ;;  %v2844_v58 = vsel %vm1370_vm3, %v2838_v52, -1e+30 }
 0x58c   :  { %v1117_v61 = vmax.f32 %v1034_v55, 0.0  ;;  %1389 = vmax.xlane.f32.xlu0 %v2844_v58  ;;  %v1086_v4 = vadd.f32 %v1085_v56, %v2789_v7 }
 0x58e   :  { %v1137_v63 = vpack.c.bf16 %v1117_v61, %v1115_v59  ;;  %v1286_v44 = vpop.f32.mrf.mxu1  ;;  %v1335_v57 = vpop.f32.mrf.mxu2  ;;  %v1120_v6 = vmax.f32 %v1086_v4, 0.0 }
 0x58f   :  { %v1287_v39 = vadd.f32 %v1286_v44, %v2822_v45 }
 0x590   :  { %1305 = vmatmul.bf16.gmra.mxu1 %v1137_v63 }
 0x591   :  { %v2848_v0 = vadd.f32 %v1335_v57, %v1287_v39  ;;  %v1036_v2 = vpop.f32.mrf.mxu3 }
 0x592   :  { %v1037_v11 = vadd.f32 %v1036_v2, %v2792_v19 }
 0x593   :  { %v1087_v5 = vpop.f32.mrf.mxu0  ;;  %v2854_v1 = vsel %vm1370_vm3, %v2848_v0, -1e+30 }
 0x594   :  { %v1088_v51 = vadd.f32 %v1087_v5, %v2789_v7  ;;  %1391 = vmax.xlane.f32.xlu1 %v2854_v1  ;;  %v1119_v29 = vmax.f32 %v1037_v11, 0.0 }
 0x596   :  { %v1122_v49 = vmax.f32 %v1088_v51, 0.0  ;;  %v1288_v36 = vpop.f32.mrf.mxu1  ;;  %v1337_v10 = vpop.f32.mrf.mxu2 }
 0x597   :  { %v1289_v18 = vadd.f32 %v1288_v36, %v2822_v45 }
 0x598   :  { %v1140_v8 = vpack.c.bf16 %v1122_v49, %v1120_v6 }
 0x599   :  { %v2860_v43 = vadd.f32 %v1337_v10, %v1289_v18  ;;  %v1038_v14 = vpop.f32.mrf.mxu3 }
 0x59a   :  { %v1039_v23 = vadd.f32 %v1038_v14, %v2792_v19  ;;  %1359 = vmatmul.bf16.gmra.mxu2 %v1140_v8 }
 0x59b   :  { %v1090_v24 = vpop.f32.mrf.mxu0  ;;  %v2866_v26 = vsel %vm1370_vm3, %v2860_v43, -1e+30 }
 0x59c   :  { %v1121_v27 = vmax.f32 %v1039_v23, 0.0  ;;  %1393 = vmax.xlane.f32.xlu2 %v2866_v26  ;;  %v1091_v9 = vadd.f32 %v1090_v24, %v2789_v7 }
 0x59e   :  { %v1139_v17 = vpack.c.bf16 %v1121_v27, %v1119_v29  ;;  %v1291_v20 = vpop.f32.mrf.mxu1  ;;  %v1340_v50 = vpop.f32.mrf.mxu2  ;;  %v1124_v54 = vmax.f32 %v1091_v9, 0.0 }
 0x59f   :  { %v1292_v31 = vadd.f32 %v1291_v20, %v2822_v45 }
 0x5a0   :  { %1310 = vmatmul.bf16.gmra.mxu1 %v1139_v17 }
 0x5a1   :  { %v2870_v33 = vadd.f32 %v1340_v50, %v1292_v31  ;;  %v1041_v3 = vpop.f32.mrf.mxu3 }
 0x5a2   :  { %v1042_v30 = vadd.f32 %v1041_v3, %v2792_v19 }
 0x5a3   :  { %v1092_v35 = vpop.f32.mrf.mxu0  ;;  %v2876_v37 = vsel %vm1370_vm3, %v2870_v33, -1e+30 }
 0x5a4   :  { %v1093_v22 = vadd.f32 %v1092_v35, %v2789_v7  ;;  %1395 = vmax.xlane.f32.xlu0 %v2876_v37  ;;  %v1123_v42 = vmax.f32 %v1042_v30, 0.0 }
 0x5a6   :  { %v1126_v60 = vmax.f32 %v1093_v22, 0.0  ;;  %v1293_v16 = vpop.f32.mrf.mxu1  ;;  %v1342_v41 = vpop.f32.mrf.mxu2 }
 0x5a7   :  { %v1294_v25 = vadd.f32 %v1293_v16, %v2822_v45 }
 0x5a8   :  { %v1142_v38 = vpack.c.bf16 %v1126_v60, %v1124_v54 }
 0x5a9   :  { %v2882_v28 = vadd.f32 %v1342_v41, %v1294_v25  ;;  %v1043_v62 = vpop.f32.mrf.mxu3 }
 0x5aa   :  { %v1044_v40 = vadd.f32 %v1043_v62, %v2792_v19  ;;  %1364 = vmatmul.bf16.gmra.mxu2 %v1142_v38 }
 0x5ab   :  { %v2888_v7 = vsel %vm1370_vm3, %v2882_v28, -1e+30 }
 0x5ac   :  { %v1125_v46 = vmax.f32 %v1044_v40, 0.0  ;;  %1397 = vmax.xlane.f32.xlu1 %v2888_v7 }
 0x5ae   :  { %v1141_v47 = vpack.c.bf16 %v1125_v46, %v1123_v42  ;;  %v1296_v48 = vpop.f32.mrf.mxu1  ;;  %v1345_v13 = vpop.f32.mrf.mxu2 }
 0x5af   :  { %v1297_v32 = vadd.f32 %v1296_v48, %v2822_v45 }
 0x5b0   :  { %1315 = vmatmul.bf16.gmra.mxu1 %v1141_v47 }
 0x5b1   :  { %v2892_v15 = vadd.f32 %v1345_v13, %v1297_v32 }
 0x5b3   :  { %v2897_v19 = vsel %vm1370_vm3, %v2892_v15, -1e+30 }
 0x5b4   :  { %1399 = vmax.xlane.f32.xlu2 %v2897_v19 }
 0x5b6   :  { %v1298_v53 = vpop.f32.mrf.mxu1  ;;  %v1347_v56 = vpop.f32.mrf.mxu2 }
 0x5b7   :  { %v1299_v55 = vadd.f32 %v1298_v53, %v2822_v45 }
 0x5b9   :  { %v2901_v59 = vadd.f32 %v1347_v56, %v1299_v55 }
 0x5bb   :  { %v2906_v61 = vsel %vm1370_vm3, %v2901_v59, -1e+30 }
 0x5bc   :  { %1401 = vmax.xlane.f32.xlu0 %v2906_v61 }
 0x5f7   :  { %v1388_v3 = vpop.xlane.xlu2 %1387 }
 0x5f8   :  { %v1419_v35 = vsub.f32 %v2832_v21, %v1388_v3 }
 0x5fa   :  { %v1435_v16 = vmul.f32 1.442695, %v1419_v35 }
 0x5fc   :  { %1994 = vpow2.f32 %v1435_v16 }
 0x5fd   :  { %v1301_v63 = vpop.f32.mrf.mxu1  ;;  %v1350_v44 = vpop.f32.mrf.mxu2 }
 0x5fe   :  { %v1302_v57 = vadd.f32 %v1301_v63, %v2822_v45 }
 0x5ff   :  { %v1390_v30 = vpop.xlane.xlu0 %1389 }
 0x600   :  { %v2910_v39 = vadd.f32 %v1350_v44, %v1302_v57  ;;  %v1420_v21 = vsub.f32 %v2844_v58, %v1390_v30 }
 0x602   :  { %v2915_v2 = vsel %vm1370_vm3, %v2910_v39, -1e+30  ;;  %v1437_v32 = vmul.f32 1.442695, %v1420_v21  ;;  %v2969_v55 = vpop.eup %1994 }
 0x603   :  { %1403 = vmax.xlane.f32.xlu1 %v2915_v2 }
 0x605   :  { %v1303_v4 = vpop.f32.mrf.mxu1  ;;  %v1352_v5 = vpop.f32.mrf.mxu2 }
 0x606   :  { %v1304_v51 = vadd.f32 %v1303_v4, %v2822_v45 }
 0x607   :  { %v1392_v47 = vpop.xlane.xlu1 %1391 }
 0x608   :  { %v2919_v6 = vadd.f32 %v1352_v5, %v1304_v51  ;;  %v1421_v58 = vsub.f32 %v2854_v1, %v1392_v47 }
 0x60a   :  { %v2924_v49 = vsel %vm1370_vm3, %v2919_v6, -1e+30  ;;  %v1439_v5 = vmul.f32 1.442695, %v1421_v58 }
 0x60b   :  { %1405 = vmax.xlane.f32.xlu2 %v2924_v49 }
 0x60d   :  { %v1306_v36 = vpop.f32.mrf.mxu1  ;;  %v1355_v10 = vpop.f32.mrf.mxu2 }
 0x60e   :  { %v1307_v18 = vadd.f32 %v1306_v36, %v2822_v45 }
 0x60f   :  { %v1394_v25 = vpop.xlane.xlu2 %1393 }
 0x610   :  { %v2928_v11 = vadd.f32 %v1355_v10, %v1307_v18  ;;  %v1422_v62 = vsub.f32 %v2866_v26, %v1394_v25 }
 0x612   :  { %v2933_v8 = vsel %vm1370_vm3, %v2928_v11, -1e+30  ;;  %v1441_v48 = vmul.f32 1.442695, %v1422_v62 }
 0x613   :  { %1407 = vmax.xlane.f32.xlu0 %v2933_v8 }
 0x614   :  { %1996 = vpow2.f32 %v1441_v48 }
 0x615   :  { %v1308_v14 = vpop.f32.mrf.mxu1  ;;  %v1357_v23 = vpop.f32.mrf.mxu2  ;;  %1998 = vpow2.f32 %v1437_v32 }
 0x616   :  { %v1309_v24 = vadd.f32 %v1308_v14, %v2822_v45  ;;  %2000 = vpow2.f32 %v1439_v5 }
 0x617   :  { %v1396_v56 = vpop.xlane.xlu0 %1395 }
 0x618   :  { %v2937_v29 = vadd.f32 %v1357_v23, %v1309_v24  ;;  %v1423_v44 = vsub.f32 %v2876_v37, %v1396_v56 }
 0x61a   :  { %v2942_v27 = vsel %vm1370_vm3, %v2937_v29, -1e+30  ;;  %v1443_v18 = vmul.f32 1.442695, %v1423_v44  ;;  %v2984_v14 = vpop.eup %1996 }
 0x61b   :  { %1409 = vmax.xlane.f32.xlu1 %v2942_v27  ;;  %v2991_v24 = vpop.eup %1998 }
 0x61d   :  { %v1311_v17 = vpop.f32.mrf.mxu1  ;;  %v1360_v20 = vpop.f32.mrf.mxu2 }
 0x61e   :  { %v1312_v50 = vadd.f32 %v1311_v17, %v2822_v45 }
 0x61f   :  { %v1398_v1 = vpop.xlane.xlu1 %1397 }
 0x620   :  { %v2946_v31 = vadd.f32 %v1360_v20, %v1312_v50  ;;  %v2998_v20 = vpop.eup %2000 }
 0x622   :  { %v2951_v9 = vsel %vm1370_vm3, %v2946_v31, -1e+30 }
 0x623   :  { %1411 = vmax.xlane.f32.xlu2 %v2951_v9 }
 0x625   :  { %v1313_v22 = vpop.f32.mrf.mxu1  ;;  %v1362_v54 = vpop.f32.mrf.mxu2 }
 0x626   :  { %v1314_v60 = vadd.f32 %v1313_v22, %v2822_v45 }
 0x627   :  { %v1400_v53 = vpop.xlane.xlu2 %1399 }
 0x628   :  { %v2956_v41 = vadd.f32 %v1362_v54, %v1314_v60  ;;  %v1425_v26 = vsub.f32 %v2897_v19, %v1400_v53 }
 0x62a   :  { %v2961_v38 = vsel %vm1370_vm3, %v2956_v41, -1e+30  ;;  %v1447_v36 = vmul.f32 1.442695, %v1425_v26 }
 0x62b   :  { %1413 = vmax.xlane.f32.xlu0 %v2961_v38 }
 0x62c   :  { %2002 = vpow2.f32 %v1447_v36 }
 0x62d   :  { %v1316_v40 = vpop.f32.mrf.mxu1  ;;  %v1365_v42 = vpop.f32.mrf.mxu2  ;;  %2004 = vpow2.f32 %v1443_v18 }
 0x62e   :  { %v1317_v46 = vadd.f32 %v1316_v40, %v2822_v45 }
 0x62f   :  { %v1402_v23 = vpop.xlane.xlu0 %1401 }
 0x630   :  { %v2967_v13 = vadd.f32 %v1365_v42, %v1317_v46  ;;  %v1426_v37 = vsub.f32 %v2906_v61, %v1402_v23  ;;  %v1532_v23 = vsel %vm1531_vm4, %v2826_v34, 0.0 }
 0x632   :  { %v2974_v63 = vsel %vm1370_vm3, %v2967_v13, -1e+30  ;;  %v1449_v50 = vmul.f32 1.442695, %v1426_v37  ;;  %v3000_v3 = vpop.eup %2002 }
 0x633   :  { %1467 = vadd.xlane.f32.xlu0 %v2969_v55  ;;  %1415 = vmax.xlane.f32.xlu1 %v2974_v63  ;;  %v3002_v35 = vpop.eup %2004 }
 0x635   :  { %v1318_v57 = vpop.f32.mrf.mxu1  ;;  %v1367_v51 = vpop.f32.mrf.mxu2 }
 0x636   :  { %v1319_v4 = vadd.f32 %v1318_v57, %v2822_v45  ;;  %v1424_v45 = vsub.f32 %v2888_v7, %v1398_v1 }
 0x638   :  { %v2982_v10 = vadd.f32 %v1367_v51, %v1319_v4  ;;  %v1445_v17 = vmul.f32 1.442695, %v1424_v45 }
 0x63a   :  { %v2989_v19 = vsel %vm1370_vm3, %v2982_v10, -1e+30  ;;  %2006 = vpow2.f32 %v1445_v17 }
 0x63b   :  { %1473 = vadd.xlane.f32.xlu0 %v2984_v14  ;;  %1417 = vmax.xlane.f32.xlu2 %v2989_v19  ;;  %2008 = vpow2.f32 %v1449_v50 }
 0x63c   :  { %1469 = vadd.xlane.f32.xlu1 %v2991_v24 }
 0x640   :  { %v3007_v7 = vpop.eup %2006 }
 0x641   :  { %v3009_v22 = vpop.eup %2008 }
 0x643   :  { %1479 = vadd.xlane.f32.xlu0 %v3000_v3  ;;  %1471 = vadd.xlane.f32.xlu2 %v2998_v20 }
 0x644   :  { %1475 = vadd.xlane.f32.xlu1 %v3002_v35 }
 0x64b   :  { %1477 = vadd.xlane.f32.xlu2 %v3007_v7 }
 0x64c   :  { %1481 = vadd.xlane.f32.xlu1 %v3009_v22 }
 0x676   :  { %v1404_v61 = vpop.xlane.xlu1 %1403 }
 0x677   :  { %v1427_v54 = vsub.f32 %v2915_v2, %v1404_v61 }
 0x679   :  { %v1451_v60 = vmul.f32 1.442695, %v1427_v54 }
 0x67b   :  { %2010 = vpow2.f32 %v1451_v60  ;;  %v1535_v60 = vsel %vm1531_vm4, %v2860_v43, 0.0 }
 0x67e   :  { %v1406_v16 = vpop.xlane.xlu2 %1405 }
 0x67f   :  { %v1428_v25 = vsub.f32 %v2924_v49, %v1406_v16 }
 0x681   :  { %v3015_v30 = vpop.eup %2010  ;;  %v1453_v62 = vmul.f32 1.442695, %v1428_v25 }
 0x682   :  { %1483 = vadd.xlane.f32.xlu2 %v3015_v30 }
 0x683   :  { %2012 = vpow2.f32 %v1453_v62  ;;  %v1533_v62 = vsel %vm1531_vm4, %v2838_v52, 0.0 }
 0x686   :  { %v1408_v21 = vpop.xlane.xlu0 %1407 }
 0x687   :  { %v1429_v40 = vsub.f32 %v2933_v8, %v1408_v21 }
 0x689   :  { %v3019_v42 = vpop.eup %2012  ;;  %v1455_v46 = vmul.f32 1.442695, %v1429_v40 }
 0x68a   :  { %1485 = vadd.xlane.f32.xlu0 %v3019_v42 }
 0x68b   :  { %2014 = vpow2.f32 %v1455_v46 }
 0x68e   :  { %v1410_v2 = vpop.xlane.xlu1 %1409 }
 0x68f   :  { %v1430_v47 = vsub.f32 %v2942_v27, %v1410_v2 }
 0x691   :  { %v3023_v48 = vpop.eup %2014  ;;  %v1457_v49 = vmul.f32 1.442695, %v1430_v47  ;;  %v1538_v47 = vsel %vm1531_vm4, %v2892_v15, 0.0 }
 0x692   :  { %1487 = vadd.xlane.f32.xlu1 %v3023_v48 }
 0x693   :  { %2016 = vpow2.f32 %v1457_v49 }
 0x696   :  { %v1412_v32 = vpop.xlane.xlu2 %1411 }
 0x697   :  { %v1431_v53 = vsub.f32 %v2951_v9, %v1412_v32 }
 0x699   :  { %v3027_v56 = vpop.eup %2016  ;;  %v1459_v8 = vmul.f32 1.442695, %v1431_v53  ;;  %v1534_v53 = vsel %vm1531_vm4, %v2848_v0, 0.0 }
 0x69a   :  { %1489 = vadd.xlane.f32.xlu2 %v3027_v56 }
 0x69b   :  { %2018 = vpow2.f32 %v1459_v8 }
 0x69e   :  { %v1414_v58 = vpop.xlane.xlu0 %1413 }
 0x69f   :  { %v1432_v26 = vsub.f32 %v2961_v38, %v1414_v58 }
 0x6a1   :  { %v3031_v44 = vpop.eup %2018  ;;  %v1461_v27 = vmul.f32 1.442695, %v1432_v26  ;;  %v1537_v26 = vsel %vm1531_vm4, %v2882_v28, 0.0 }
 0x6a2   :  { %1491 = vadd.xlane.f32.xlu0 %v3031_v44 }
 0x6a3   :  { %2020 = vpow2.f32 %v1461_v27 }
 0x6a6   :  { %v1468_v57 = vpop.xlane.xlu0 %1467  ;;  %v1416_v4 = vpop.xlane.xlu1 %1415 }
 0x6a7   :  { %2022 = vrcp.f32 %v1468_v57  ;;  %v1433_v9 = vsub.f32 %v2974_v63, %v1416_v4  ;;  %v1539_v57 = vsel %vm1531_vm4, %v2901_v59, 0.0 }
 0x6a9   :  { %v3035_v5 = vpop.eup %2020  ;;  %v1463_v51 = vmul.f32 1.442695, %v1433_v9 }
 0x6aa   :  { %1493 = vadd.xlane.f32.xlu1 %v3035_v5 }
 0x6ab   :  { %2024 = vpow2.f32 %v1463_v51  ;;  %v1540_v51 = vsel %vm1531_vm4, %v2910_v39, 0.0 }
 0x6ad   :  { %v2023_v38 = vpop.eup %2022 }
 0x6ae   :  { %v1515_v36 = vmul.f32 %v2023_v38, %v2969_v55  ;;  %v1474_v18 = vpop.xlane.xlu0 %1473  ;;  %v1418_v1 = vpop.xlane.xlu2 %1417 }
 0x6af   :  { %2026 = vrcp.f32 %v1474_v18  ;;  %v1434_v63 = vsub.f32 %v2989_v19, %v1418_v1  ;;  %v1470_v45 = vpop.xlane.xlu1 %1469 }
 0x6b0   :  { %v1548_v37 = vsel %vm1370_vm3, %v1515_v36, %v1532_v23  ;;  %2028 = vrcp.f32 %v1470_v45 }
 0x6b1   :  { %v3046_v17 = vpop.eup %2024  ;;  %1564 = vst [vmem:[%s3197_s7] sm:$0xff] %v1548_v37  ;;  %v1465_v55 = vmul.f32 1.442695, %v1434_v63 }
 0x6b2   :  { %1495 = vadd.xlane.f32.xlu2 %v3046_v17 }
 0x6b3   :  { %2030 = vpow2.f32 %v1465_v55 }
 0x6b5   :  { %v2027_v50 = vpop.eup %2026 }
 0x6b6   :  { %v2029_v34 = vpop.eup %2028  ;;  %v1518_v61 = vmul.f32 %v2027_v50, %v2984_v14  ;;  %v1480_v19 = vpop.xlane.xlu0 %1479 }
 0x6b7   :  { %v1472_v54 = vpop.xlane.xlu2 %1471  ;;  %v1516_v16 = vmul.f32 %v2029_v34, %v2991_v24  ;;  %2032 = vrcp.f32 %v1480_v19  ;;  %v1476_v25 = vpop.xlane.xlu1 %1475 }
 0x6b8   :  { %v1551_v21 = vsel %vm1370_vm3, %v1518_v61, %v1535_v60  ;;  %2034 = vrcp.f32 %v1472_v54 }
 0x6b9   :  { %v3062_v40 = vpop.eup %2030  ;;  %1567 = vst [vmem:[%s3197_s7 + $0x18] sm:$0xff] %v1551_v21  ;;  %v1549_v43 = vsel %vm1370_vm3, %v1516_v16, %v1533_v62  ;;  %2036 = vrcp.f32 %v1476_v25 }
 0x6ba   :  { %1565 = vst [vmem:[%s3197_s7 + $0x8] sm:$0xff] %v1549_v43  ;;  %1497 = vadd.xlane.f32.xlu0 %v3062_v40 }
 0x6bd   :  { %v2033_v52 = vpop.eup %2032 }
 0x6be   :  { %v2035_v14 = vpop.eup %2034  ;;  %v1521_v24 = vmul.f32 %v2033_v52, %v3000_v3  ;;  %v1536_v3 = vsel %vm1531_vm4, %v2870_v33, 0.0 }
 0x6bf   :  { %v1478_v46 = vpop.xlane.xlu2 %1477  ;;  %v2037_v2 = vpop.eup %2036  ;;  %v1517_v49 = vmul.f32 %v2035_v14, %v2998_v20 }
 0x6c0   :  { %2038 = vrcp.f32 %v1478_v46  ;;  %v1482_v32 = vpop.xlane.xlu1 %1481  ;;  %v1554_v8 = vsel %vm1370_vm3, %v1521_v24, %v1538_v47  ;;  %v1519_v58 = vmul.f32 %v2037_v2, %v3002_v35 }
 0x6c1   :  { %2040 = vrcp.f32 %v1482_v32  ;;  %1570 = vst [vmem:[%s3197_s7 + $0x30] sm:$0xff] %v1554_v8  ;;  %v1550_v15 = vsel %vm1370_vm3, %v1517_v49, %v1534_v53 }
 0x6c2   :  { %1566 = vst [vmem:[%s3197_s7 + $0x10] sm:$0xff] %v1550_v15  ;;  %v1552_v0 = vsel %vm1370_vm3, %v1519_v58, %v1536_v3 }
 0x6c3   :  { %1568 = vst [vmem:[%s3197_s7 + $0x20] sm:$0xff] %v1552_v0 }
 0x6c6   :  { %v2039_v20 = vpop.eup %2038 }
 0x6c7   :  { %v2041_v33 = vpop.eup %2040  ;;  %v1520_v35 = vmul.f32 %v2039_v20, %v3007_v7 }
 0x6c8   :  { %v1522_v27 = vmul.f32 %v2041_v33, %v3009_v22 }
 0x6c9   :  { %v1553_v4 = vsel %vm1370_vm3, %v1520_v35, %v1537_v26 }
 0x6ca   :  { %1569 = vst [vmem:[%s3197_s7 + $0x28] sm:$0xff] %v1553_v4  ;;  %v1555_v7 = vsel %vm1370_vm3, %v1522_v27, %v1539_v57 }
 0x6cb   :  { %1571 = vst [vmem:[%s3197_s7 + $0x38] sm:$0xff] %v1555_v7 }
 0x6f5   :  { %v1484_v28 = vpop.xlane.xlu2 %1483 }
 0x6f6   :  { %2042 = vrcp.f32 %v1484_v28 }
 0x6fc   :  { %v2043_v22 = vpop.eup %2042 }
 0x6fd   :  { %v1523_v9 = vmul.f32 %v2043_v22, %v3015_v30  ;;  %v1486_v59 = vpop.xlane.xlu0 %1485  ;;  %v1541_v30 = vsel %vm1531_vm4, %v2919_v6, 0.0 }
 0x6fe   :  { %2044 = vrcp.f32 %v1486_v59 }
 0x6ff   :  { %v1556_v38 = vsel %vm1370_vm3, %v1523_v9, %v1540_v51 }
 0x700   :  { %1572 = vst [vmem:[%s3197_s7 + $0x40] sm:$0xff] %v1556_v38 }
 0x704   :  { %v2045_v36 = vpop.eup %2044 }
 0x705   :  { %v1524_v18 = vmul.f32 %v2045_v36, %v3019_v42  ;;  %v1488_v1 = vpop.xlane.xlu1 %1487  ;;  %v1542_v42 = vsel %vm1531_vm4, %v2928_v11, 0.0 }
 0x706   :  { %2046 = vrcp.f32 %v1488_v1 }
 0x707   :  { %v1557_v39 = vsel %vm1370_vm3, %v1524_v18, %v1541_v30 }
 0x708   :  { %1573 = vst [vmem:[%s3197_s7 + $0x48] sm:$0xff] %v1557_v39 }
 0x70c   :  { %v2047_v23 = vpop.eup %2046 }
 0x70d   :  { %v1525_v63 = vmul.f32 %v2047_v23, %v3023_v48  ;;  %v1490_v45 = vpop.xlane.xlu2 %1489  ;;  %v1543_v48 = vsel %vm1531_vm4, %v2937_v29, 0.0 }
 0x70e   :  { %2048 = vrcp.f32 %v1490_v45 }
 0x70f   :  { %v1558_v6 = vsel %vm1370_vm3, %v1525_v63, %v1542_v42 }
 0x710   :  { %1574 = vst [vmem:[%s3197_s7 + $0x50] sm:$0xff] %v1558_v6 }
 0x714   :  { %v2049_v37 = vpop.eup %2048 }
 0x715   :  { %v1526_v55 = vmul.f32 %v2049_v37, %v3027_v56  ;;  %v1492_v50 = vpop.xlane.xlu0 %1491  ;;  %v1544_v56 = vsel %vm1531_vm4, %v2946_v31, 0.0 }
 0x716   :  { %2050 = vrcp.f32 %v1492_v50 }
 0x717   :  { %v1559_v11 = vsel %vm1370_vm3, %v1526_v55, %v1543_v48 }
 0x718   :  { %1575 = vst [vmem:[%s3197_s7 + $0x58] sm:$0xff] %v1559_v11 }
 0x71c   :  { %v2051_v34 = vpop.eup %2050 }
 0x71d   :  { %v1527_v61 = vmul.f32 %v2051_v34, %v3031_v44  ;;  %v1494_v19 = vpop.xlane.xlu1 %1493  ;;  %v1545_v44 = vsel %vm1531_vm4, %v2956_v41, 0.0 }
 0x71e   :  { %2052 = vrcp.f32 %v1494_v19 }
 0x71f   :  { %v1560_v29 = vsel %vm1370_vm3, %v1527_v61, %v1544_v56 }
 0x720   :  { %1576 = vst [vmem:[%s3197_s7 + $0x60] sm:$0xff] %v1560_v29 }
 0x724   :  { %v2053_v54 = vpop.eup %2052 }
 0x725   :  { %v1528_v60 = vmul.f32 %v2053_v54, %v3035_v5  ;;  %v1496_v16 = vpop.xlane.xlu2 %1495  ;;  %v1546_v5 = vsel %vm1531_vm4, %v2967_v13, 0.0 }
 0x726   :  { %2054 = vrcp.f32 %v1496_v16 }
 0x727   :  { %v1561_v31 = vsel %vm1370_vm3, %v1528_v60, %v1545_v44 }
 0x728   :  { %1577 = vst [vmem:[%s3197_s7 + $0x68] sm:$0xff] %v1561_v31 }
 0x72c   :  { %v2055_v25 = vpop.eup %2054 }
 0x72d   :  { %v1529_v62 = vmul.f32 %v2055_v25, %v3046_v17  ;;  %v1498_v21 = vpop.xlane.xlu0 %1497  ;;  %v1547_v17 = vsel %vm1531_vm4, %v2982_v10, 0.0 }
 0x72e   :  { %2056 = vrcp.f32 %v1498_v21 }
 0x72f   :  { %v1562_v41 = vsel %vm1370_vm3, %v1529_v62, %v1546_v5 }
 0x730   :  { %1578 = vst [vmem:[%s3197_s7 + $0x70] sm:$0xff] %v1562_v41 }
 0x734   :  { %v2057_v43 = vpop.eup %2056 }
 0x735   :  { %v1530_v52 = vmul.f32 %v2057_v43, %v3062_v40 }
 0x737   :  { %v1563_v14 = vsel %vm1370_vm3, %v1530_v52, %v1547_v17 }
 0x738   :  { %1579 = vst [vmem:[%s3197_s7 + $0x78] sm:$0xff] %v1563_v14 }

</bundles_post_ra>
